<compile_context>
chip_gen: v7x
topology: tpu7x:2x2x1
jax: 0.10.0
libtpu: 0.0.40
codegen_flags: <defaults>
</compile_context>

<pallas_src>
import jax
import jax.numpy as jnp
from jax.experimental import pallas as pl
from jax.experimental.pallas import tpu as pltpu

DIM_PTS = 10        # 3 xyz + 3 rgb + 3 normal + 1 (edge mask channel)
H1 = 64
H2 = 128
OUT_DIM = 32        # cfg.model.edge_feature_dim
N_POINTS = 64       # points per edge sample
BN_EPS = 1e-5


def _round_up(x, m):
    return ((x + m - 1) // m) * m


def _pick_tb(batch):
    """Batch tile: multiple of 8, <=128, and leaves >=2 grid steps if possible."""
    tb = min(128, _round_up(batch, 8))
    if batch > 8:
        # Keep at least 2 grid steps so both v7x TensorCores get work.
        tb = min(tb, max(8, _round_up(-(-batch // 2), 8)))
    return tb


def _pointnet_edge_kernel(x_ref, w1_ref, b1_ref, w2_ref, b2_ref, w3_ref, b3_ref,
                          o_ref):
    """One batch tile per grid step.

    x_ref : (TB, N, C_in)  bf16 points for TB edges
    wk_ref: (C_in_k, C_out_k) bf16 folded (conv * BN-scale) weights
    bk_ref: (1, C_out_k)  f32 folded (conv bias * BN-scale + BN-shift)
    o_ref : (TB, OUT_DIM) f32 max-pooled global features
    """
    tb, n, c = x_ref.shape
    x2d = x_ref[...].reshape(tb * n, c)                      # (TB*N, C_in) bf16

    # layer 1: 1x1 conv (+ folded BN) -> ReLU
    h = jnp.dot(x2d, w1_ref[...], preferred_element_type=jnp.float32)
    h = jnp.maximum(h + b1_ref[...], 0.0).astype(jnp.bfloat16)

    # layer 2: 1x1 conv (+ folded BN) -> ReLU
    h = jnp.dot(h, w2_ref[...], preferred_element_type=jnp.float32)
    h = jnp.maximum(h + b2_ref[...], 0.0).astype(jnp.bfloat16)

    # layer 3: 1x1 conv (+ folded BN), no ReLU before the global max pool
    h = jnp.dot(h, w3_ref[...], preferred_element_type=jnp.float32)
    h = h + b3_ref[...]                                      # (TB*N, OUT) f32

    # global max pool over the point dimension
    o_ref[...] = jnp.max(h.reshape(tb, n, OUT_DIM), axis=1)  # (TB, OUT)


def edge_encoder_sgpn(x_ncw, params, tb=None):
    """x_ncw: (B, dim_pts, N_points) float32, same layout as the PyTorch module.

    Returns (B, OUT_DIM) float32.
    """
    B, C, N = x_ncw.shape
    assert C == DIM_PTS and N == N_POINTS

    (w1, b1, s1, t1, w2, b2, s2, t2, w3, b3, s3, t3) = params

    # Fold conv bias + eval-mode BatchNorm into the weights:
    #   y = (x @ W + b) * s + t  ==  x @ (W * s) + (b * s + t)
    def fold(w, b, s, t):
        wf = (w * s).astype(jnp.bfloat16)        # (cin, cout), bf16 for the MXU
        bf = (b * s + t).astype(jnp.float32)     # (1, cout), f32 accumulation path
        return wf, bf

    w1f, b1f = fold(w1, b1, s1, t1)
    w2f, b2f = fold(w2, b2, s2, t2)
    w3f, b3f = fold(w3, b3, s3, t3)

    # NCW -> (B, N, C): channels on the lane axis; bf16 halves the HBM traffic
    # of the only large DMA.
    x = jnp.transpose(x_ncw, (0, 2, 1)).astype(jnp.bfloat16)

    # Batch tiling + zero-pad B up to a multiple of TB (padded rows are sliced
    # off the output, so their values never matter).
    if tb is None:
        tb = _pick_tb(B)
    B_pad = _round_up(B, tb)
    if B_pad != B:
        x = jnp.pad(x, ((0, B_pad - B), (0, 0), (0, 0)))
    grid = (B_pad // tb,)

    def whole(arr):
        nd = arr.ndim
        return pl.BlockSpec(arr.shape, lambda i, _nd=nd: (0,) * _nd)

    grid_spec = pl.GridSpec(
        grid=grid,
        in_specs=[
            pl.BlockSpec((tb, N, C), lambda i: (i, 0, 0)),
            whole(w1f), whole(b1f),
            whole(w2f), whole(b2f),
            whole(w3f), whole(b3f),
        ],
        out_specs=pl.BlockSpec((tb, OUT_DIM), lambda i: (i, 0)),
    )

    out = pl.pallas_call(
        _pointnet_edge_kernel,
        out_shape=jax.ShapeDtypeStruct((B_pad, OUT_DIM), jnp.float32),
        grid_spec=grid_spec,
        compiler_params=pltpu.CompilerParams(
            dimension_semantics=("parallel",)),
    )(x, w1f, b1f, w2f, b2f, w3f, b3f)

    return out[:B]


def make_params(key):
    """Deterministic synthetic parameters (shapes match the PyTorch module)."""
    ks = jax.random.split(key, 6)

    def conv_layer(kw, kb, cin, cout):
        # PyTorch Conv1d weight is (cout, cin, 1); stored transposed (cin, cout)
        # so the kernel does x @ W directly.
        w = jax.random.normal(kw, (cin, cout), jnp.float32) * (1.0 / jnp.sqrt(cin))
        b = jax.random.normal(kb, (1, cout), jnp.float32) * 0.01
        return w, b

    w1, b1 = conv_layer(ks[0], ks[1], DIM_PTS, H1)
    w2, b2 = conv_layer(ks[2], ks[3], H1, H2)
    w3, b3 = conv_layer(ks[4], ks[5], H2, OUT_DIM)

    # BatchNorm1d at PyTorch init (eval mode): gamma=1, beta=0, mean=0, var=1,
    # folded into per-channel scale/shift: y*scale + shift.
    def bn_fold(cout):
        gamma = jnp.ones((1, cout), jnp.float32)
        beta = jnp.zeros((1, cout), jnp.float32)
        mean = jnp.zeros((1, cout), jnp.float32)
        var = jnp.ones((1, cout), jnp.float32)
        scale = gamma / jnp.sqrt(var + BN_EPS)
        shift = beta - mean * scale
        return scale, shift

    s1, t1 = bn_fold(H1)
    s2, t2 = bn_fold(H2)
    s3, t3 = bn_fold(OUT_DIM)

    return (w1, b1, s1, t1, w2, b2, s2, t2, w3, b3, s3, t3)


def reference_forward(x_ncw, params):
    """Pure-JAX f32 reference of the PyTorch forward (for correctness check)."""
    (w1, b1, s1, t1, w2, b2, s2, t2, w3, b3, s3, t3) = params
    x = jnp.transpose(x_ncw, (0, 2, 1)).astype(jnp.float32)  # (B, N, C)
    h = jnp.maximum((x @ w1 + b1) * s1 + t1, 0.0)
    h = jnp.maximum((h @ w2 + b2) * s2 + t2, 0.0)
    h = (h @ w3 + b3) * s3 + t3
    return jnp.max(h, axis=1)  # (B, OUT_DIM)


if __name__ == "__main__":
    key = jax.random.PRNGKey(0)
    k_params, k_x = jax.random.split(key)

    params = make_params(k_params)

    B = 2
    # Same layout as the PyTorch module's input: (B, dim_pts, n_points)
    x = jax.random.normal(k_x, (B, DIM_PTS, N_POINTS), jnp.float32)

    out = edge_encoder_sgpn(x, params)
    out = jax.block_until_ready(out)

    ref = reference_forward(x, params)
    assert out.shape == (B, OUT_DIM)
    # bf16 inputs/weights (f32 accumulation) -> looser tolerance vs f32 ref.
    assert jnp.allclose(out, ref, atol=1e-1, rtol=5e-2), "mismatch vs reference"

    print("KERNEL_OK")
</pallas_src>

<mosaic_0001>
module attributes {stable_mosaic.version = 11 : i64} {
  func.func @_pointnet_edge_kernel(%arg0: i32, %arg1: memref<8x64x10xbf16, #tpu.memory_space<vmem>>, %arg2: memref<10x64xbf16, #tpu.memory_space<vmem>>, %arg3: memref<1x64xf32, #tpu.memory_space<vmem>>, %arg4: memref<64x128xbf16, #tpu.memory_space<vmem>>, %arg5: memref<1x128xf32, #tpu.memory_space<vmem>>, %arg6: memref<128x32xbf16, #tpu.memory_space<vmem>>, %arg7: memref<1x32xf32, #tpu.memory_space<vmem>>, %arg8: memref<8x32xf32, #tpu.memory_space<vmem>>) attributes {dimension_semantics = [#tpu.dimension_semantics<parallel>], iteration_bounds = array<i64: 1>, scalar_prefetch = 0 : i64, scratch_operands = 0 : i64, tpu.core_type = #tpu.core_type<tc>, window_params = [{transform_indices = @transform_0, window_bounds = array<i64: 8, 64, 10>}, {pipeline_mode = #tpu.pipeline_mode<synchronous>, transform_indices = @transform_1, window_bounds = array<i64: 10, 64>}, {pipeline_mode = #tpu.pipeline_mode<synchronous>, transform_indices = @transform_2, window_bounds = array<i64: 1, 64>}, {pipeline_mode = #tpu.pipeline_mode<synchronous>, transform_indices = @transform_3, window_bounds = array<i64: 64, 128>}, {pipeline_mode = #tpu.pipeline_mode<synchronous>, transform_indices = @transform_4, window_bounds = array<i64: 1, 128>}, {pipeline_mode = #tpu.pipeline_mode<synchronous>, transform_indices = @transform_5, window_bounds = array<i64: 128, 32>}, {pipeline_mode = #tpu.pipeline_mode<synchronous>, transform_indices = @transform_6, window_bounds = array<i64: 1, 32>}, {transform_indices = @transform_7, window_bounds = array<i64: 8, 32>}]} {
    %c0 = arith.constant 0 : index
    %c0_0 = arith.constant 0 : index
    %c0_1 = arith.constant 0 : index
    %0 = vector.load %arg1[%c0, %c0_0, %c0_1] : memref<8x64x10xbf16, #tpu.memory_space<vmem>>, vector<8x64x10xbf16>
    %1 = vector.shape_cast %0 : vector<8x64x10xbf16> to vector<512x10xbf16>
    %c0_2 = arith.constant 0 : index
    %c0_3 = arith.constant 0 : index
    %2 = vector.load %arg2[%c0_2, %c0_3] : memref<10x64xbf16, #tpu.memory_space<vmem>>, vector<10x64xbf16>
    %cst = arith.constant dense<0.000000e+00> : vector<512x64xf32>
    %3 = tpu.matmul %1, %2, %cst {dimension_numbers = #tpu.dot_dimension_numbers<[1], [0], [0], [1], [0, 0, 1, 1], [], []>} : vector<512x10xbf16>, vector<10x64xbf16>, vector<512x64xf32> -> vector<512x64xf32>
    %c0_4 = arith.constant 0 : index
    %c0_5 = arith.constant 0 : index
    %4 = vector.load %arg3[%c0_4, %c0_5] : memref<1x64xf32, #tpu.memory_space<vmem>>, vector<1x64xf32>
    %5 = vector.broadcast %4 : vector<1x64xf32> to vector<512x64xf32>
    %6 = arith.addf %3, %5 : vector<512x64xf32>
    %cst_6 = arith.constant 0.000000e+00 : f32
    %7 = vector.broadcast %cst_6 : f32 to vector<512x64xf32>
    %8 = arith.maximumf %6, %7 : vector<512x64xf32>
    %9 = arith.truncf %8 : vector<512x64xf32> to vector<512x64xbf16>
    %c0_7 = arith.constant 0 : index
    %c0_8 = arith.constant 0 : index
    %10 = vector.load %arg4[%c0_7, %c0_8] : memref<64x128xbf16, #tpu.memory_space<vmem>>, vector<64x128xbf16>
    %cst_9 = arith.constant dense<0.000000e+00> : vector<512x128xf32>
    %11 = tpu.matmul %9, %10, %cst_9 {dimension_numbers = #tpu.dot_dimension_numbers<[1], [0], [0], [1], [0, 0, 1, 1], [], []>} : vector<512x64xbf16>, vector<64x128xbf16>, vector<512x128xf32> -> vector<512x128xf32>
    %c0_10 = arith.constant 0 : index
    %c0_11 = arith.constant 0 : index
    %12 = vector.load %arg5[%c0_10, %c0_11] : memref<1x128xf32, #tpu.memory_space<vmem>>, vector<1x128xf32>
    %13 = vector.broadcast %12 : vector<1x128xf32> to vector<512x128xf32>
    %14 = arith.addf %11, %13 : vector<512x128xf32>
    %cst_12 = arith.constant 0.000000e+00 : f32
    %15 = vector.broadcast %cst_12 : f32 to vector<512x128xf32>
    %16 = arith.maximumf %14, %15 : vector<512x128xf32>
    %17 = arith.truncf %16 : vector<512x128xf32> to vector<512x128xbf16>
    %c0_13 = arith.constant 0 : index
    %c0_14 = arith.constant 0 : index
    %18 = vector.load %arg6[%c0_13, %c0_14] : memref<128x32xbf16, #tpu.memory_space<vmem>>, vector<128x32xbf16>
    %cst_15 = arith.constant dense<0.000000e+00> : vector<512x32xf32>
    %19 = tpu.matmul %17, %18, %cst_15 {dimension_numbers = #tpu.dot_dimension_numbers<[1], [0], [0], [1], [0, 0, 1, 1], [], []>} : vector<512x128xbf16>, vector<128x32xbf16>, vector<512x32xf32> -> vector<512x32xf32>
    %c0_16 = arith.constant 0 : index
    %c0_17 = arith.constant 0 : index
    %20 = vector.load %arg7[%c0_16, %c0_17] : memref<1x32xf32, #tpu.memory_space<vmem>>, vector<1x32xf32>
    %21 = vector.broadcast %20 : vector<1x32xf32> to vector<512x32xf32>
    %22 = arith.addf %19, %21 : vector<512x32xf32>
    %23 = vector.shape_cast %22 : vector<512x32xf32> to vector<8x64x32xf32>
    %cst_18 = arith.constant dense<0xFF800000> : vector<8x32xf32>
    %24 = vector.multi_reduction <maximumf>, %23, %cst_18 [1] : vector<8x64x32xf32> to vector<8x32xf32>
    %c0_19 = arith.constant 0 : index
    %c0_20 = arith.constant 0 : index
    %25 = vector.load %arg8[%c0_19, %c0_20] : memref<8x32xf32, #tpu.memory_space<vmem>>, vector<8x32xf32>
    tpu.vector_store %arg8[%c0_19, %c0_20], %24 {strides = array<i32>} : memref<8x32xf32, #tpu.memory_space<vmem>>, vector<8x32xf32>,
    return
  }
  func.func @transform_0(%arg0: i32) -> (i32, i32, i32) {
    %c0_i32 = arith.constant 0 : i32
    %c0_i32_0 = arith.constant 0 : i32
    %c0_i32_1 = arith.constant 0 : i32
    return %arg0, %c0_i32, %c0_i32_0 : i32, i32, i32
  }
  func.func @transform_1(%arg0: i32) -> (i32, i32) {
    %c0_i32 = arith.constant 0 : i32
    %c0_i32_0 = arith.constant 0 : i32
    %c0_i32_1 = arith.constant 0 : i32
    return %c0_i32, %c0_i32_0 : i32, i32
  }
  func.func @transform_2(%arg0: i32) -> (i32, i32) {
    %c0_i32 = arith.constant 0 : i32
    %c0_i32_0 = arith.constant 0 : i32
    %c0_i32_1 = arith.constant 0 : i32
    return %c0_i32, %c0_i32_0 : i32, i32
  }
  func.func @transform_3(%arg0: i32) -> (i32, i32) {
    %c0_i32 = arith.constant 0 : i32
    %c0_i32_0 = arith.constant 0 : i32
    %c0_i32_1 = arith.constant 0 : i32
    return %c0_i32, %c0_i32_0 : i32, i32
  }
  func.func @transform_4(%arg0: i32) -> (i32, i32) {
    %c0_i32 = arith.constant 0 : i32
    %c0_i32_0 = arith.constant 0 : i32
    %c0_i32_1 = arith.constant 0 : i32
    return %c0_i32, %c0_i32_0 : i32, i32
  }
  func.func @transform_5(%arg0: i32) -> (i32, i32) {
    %c0_i32 = arith.constant 0 : i32
    %c0_i32_0 = arith.constant 0 : i32
    %c0_i32_1 = arith.constant 0 : i32
    return %c0_i32, %c0_i32_0 : i32, i32
  }
  func.func @transform_6(%arg0: i32) -> (i32, i32) {
    %c0_i32 = arith.constant 0 : i32
    %c0_i32_0 = arith.constant 0 : i32
    %c0_i32_1 = arith.constant 0 : i32
    return %c0_i32, %c0_i32_0 : i32, i32
  }
  func.func @transform_7(%arg0: i32) -> (i32, i32) {
    %c0_i32 = arith.constant 0 : i32
    %c0_i32_0 = arith.constant 0 : i32
    return %arg0, %c0_i32 : i32, i32
  }
}

</mosaic_0001>

<bundles_post_ra>
// kernel: tpu_custom_call.1
= control target key start
LH: loop header
LB: loop body
LE: loop exit
PB: predicated region body
PF: predicated region fallthrough
CT: control target
= control target key end

     0   :  { %vm363_vm0 = vcmask 1044480   ;;  %vm266_vm1 = vcmask 80896   ;;  %s2907_s0 = inlined_call_operand.vmem [shape: bf16[8,64,10], index: 0, kind: input, shape index: {}]   ;;  %s2908_s1 = inlined_call_operand.vmem [shape: bf16[10,64], index: 1, kind: input, shape index: {}]   ;;  %s2909_s2 = inlined_call_operand.vmem [shape: f32[1,64], index: 2, kind: input, shape index: {}]   ;;  %s2910_s3 = inlined_call_operand.vmem [shape: bf16[64,128], index: 3, kind: input, shape index: {}]   ;;  %s2911_s4 = inlined_call_operand.vmem [shape: f32[1,128], index: 4, kind: input, shape index: {}]   ;;  %s2912_s5 = inlined_call_operand.vmem [shape: bf16[128,32], index: 5, kind: input, shape index: {}]   ;;  %s2913_s6 = inlined_call_operand.vmem [shape: f32[1,32], index: 6, kind: input, shape index: {}]   ;;  %s2914_s7 = inlined_call_operand.hbm [shape: f32[8,32], index: 7, kind: output, shape index: {}]  }
   0x1   :  { %v2284_v0 = vld [vmem:[%s2908_s1] sm:$0x1f]   ;;  %v2286_v3 = vld [vmem:[%s2907_s0 + $0x8] sm:$0xff]   ;;  %v2287_v4 = vld [vmem:[%s2907_s0 + $0x10] sm:$0xff]  }
   0x2   :  { %v2285_v1 = vld [vmem:[%s2907_s0] sm:$0xff]   ;;  %2281 = vmatprep.subr.msk.bf16.mxu0 %vm363_vm0, %v2284_v0  ;;  %v365_v2 = vsel %vm363_vm0, %v2284_v0, 0  ;;  %2282 = vmatprep.subr.msk.bf16.mxu1 %vm363_vm0, %v2284_v0  ;;  %v2288_v5 = vld [vmem:[%s2907_s0 + $0x18] sm:$0xff]   ;;  %v2290_v7 = vld [vmem:[%s2907_s0 + $0x28] sm:$0xff]  }
   0x3   :  { %2062 = vmatpush3.bf16.msra.mxu0 %v365_v2  ;;  %2063 = vmatprep.mubr.msk.bf16.mxu0 %vm266_vm1, %v2285_v1  ;;  %v2289_v6 = vld [vmem:[%s2907_s0 + $0x20] sm:$0xff]   ;;  %v2291_v8 = vld [vmem:[%s2907_s0 + $0x30] sm:$0xff]   ;;  %v2302_v10 = vld [vmem:[%s2907_s0 + $0x88] sm:$0xff]  }
   0x4   :  { %2280 = vmatpush3.bf16.msra.mxu1 %v365_v2  ;;  %v2301_v9 = vld [vmem:[%s2907_s0 + $0x80] sm:$0xff]   ;;  %v2303_v11 = vld [vmem:[%s2907_s0 + $0x90] sm:$0xff]   ;;  %v2292_v12 = vld [vmem:[%s2907_s0 + $0x38] sm:$0xff]  }
   0x5   :  { %2095 = vmatprep.mubr.msk.bf16.mxu1 %vm266_vm1, %v2301_v9  ;;  %v2304_v13 = vld [vmem:[%s2907_s0 + $0x98] sm:$0xff]   ;;  %v2305_v14 = vld [vmem:[%s2907_s0 + $0xa0] sm:$0xff]   ;;  %v2294_v16 = vld [vmem:[%s2907_s0 + $0x48] sm:$0xff]  }
   0x6   :  { %2064 = vmatmul.mubr.msk.bf16.vlgmr.msra.gmra.mrb[0].mxu0 %vm266_vm1, %v2286_v3  ;;  %v2293_v15 = vld [vmem:[%s2907_s0 + $0x40] sm:$0xff]   ;;  %v2306_v17 = vld [vmem:[%s2907_s0 + $0xa8] sm:$0xff]   ;;  %v2307_v18 = vld [vmem:[%s2907_s0 + $0xb0] sm:$0xff]  }
   0x7   :  { %2067 = vmatprep.mubr.msk.bf16.mxu0 %vm266_vm1, %v2287_v4  ;;  %2096 = vmatmul.mubr.msk.bf16.vlgmr.msra.gmra.mrb[0].mxu1 %vm266_vm1, %v2302_v10  ;;  %v2317_v19 = vld [vmem:[%s2910_s3] sm:$0xff]   ;;  %v2295_v20 = vld [vmem:[%s2907_s0 + $0x50] sm:$0xff]   ;;  %v2318_v21 = vld [vmem:[%s2910_s3 + $0x8] sm:$0xff]  }
   0x8   :  { %2099 = vmatprep.mubr.msk.bf16.mxu1 %vm266_vm1, %v2303_v11  ;;  %2127 = vmatprep.subr.bf16.mxu1 %v2317_v19  ;;  %v2319_v22 = vld [vmem:[%s2910_s3 + $0x10] sm:$0xff]   ;;  %v2308_v23 = vld [vmem:[%s2907_s0 + $0xb8] sm:$0xff]   ;;  %v2309_v25 = vld [vmem:[%s2907_s0 + $0xc0] sm:$0xff]  }
   0x9   :  { %2128 = vmatpush3.bf16.msra.mxu1 %v2317_v19  ;;  %v2296_v24 = vld [vmem:[%s2907_s0 + $0x58] sm:$0xff]  }
   0xa   :  { %2129 = vmatprep.subr.bf16.mxu1 %v2318_v21 }
   0xe   :  { %2068 = vmatmul.mubr.msk.bf16.gmra.mrb[4].mxu0 %vm266_vm1, %v2288_v5 }
   0xf   :  { %2071 = vmatprep.mubr.msk.bf16.mxu0 %vm266_vm1, %v2289_v6  ;;  %2100 = vmatmul.mubr.msk.bf16.gmra.mrb[4].mxu1 %vm266_vm1, %v2304_v13 }
  0x10   :  { %2103 = vmatprep.mubr.msk.bf16.mxu1 %vm266_vm1, %v2305_v14 }
  0x16   :  { %2072 = vmatmul.mubr.msk.bf16.gmra.mrb[8].mxu0 %vm266_vm1, %v2290_v7 }
  0x17   :  { %2075 = vmatprep.mubr.msk.bf16.mxu0 %vm266_vm1, %v2291_v8  ;;  %2104 = vmatmul.mubr.msk.bf16.gmra.mrb[8].mxu1 %vm266_vm1, %v2306_v17 }
  0x18   :  { %2107 = vmatprep.mubr.msk.bf16.mxu1 %vm266_vm1, %v2307_v18 }
  0x1e   :  { %2076 = vmatmul.mubr.msk.bf16.gmra.mrb[12].mxu0 %vm266_vm1, %v2292_v12 }
  0x1f   :  { %2079 = vmatprep.mubr.msk.bf16.mxu0 %vm266_vm1, %v2293_v15 }
  0x26   :  { %2080 = vmatmul.mubr.msk.bf16.gmra.mrb[16].mxu0 %vm266_vm1, %v2294_v16 }
  0x27   :  { %2083 = vmatprep.mubr.msk.bf16.mxu0 %vm266_vm1, %v2295_v20 }
  0x28   :  { %12 = vsyncpa [#allocation3], 0  ;;  %v2297_v26 = vld [vmem:[%s2907_s0 + $0x60] sm:$0xff]   ;;  %2130 = vmatpush3.bf16.msra.mxu1 %v2318_v21  ;;  %v2320_v27 = vld [vmem:[%s2910_s3 + $0x18] sm:$0xff]   ;;  %vm791_vm2 = vcmask 523264   ;;  %vm1633_vm3 = vcmask 261120  }
  0x29   :  { %2131 = vmatprep.subr.bf16.mxu1 %v2319_v22  ;;  %2108 = vmatmul.mubr.msk.bf16.gmra.mrb[12].mxu1 %vm266_vm1, %v2308_v23  ;;  %v2310_v28 = vld [vmem:[%s2907_s0 + $0xc8] sm:$0xff]   ;;  %v2311_v30 = vld [vmem:[%s2907_s0 + $0xd0] sm:$0xff]   ;;  %v2312_v32 = vld [vmem:[%s2907_s0 + $0xd8] sm:$0xff]   ;;  %vm1810_vm4 = vcmask 1041409   ;;  %vm1812_vm5 = vcmask 1042434   ;;  %vm1814_vm6 = vcmask 1043459  }
  0x2a   :  { %2111 = vmatprep.mubr.msk.bf16.mxu1 %vm266_vm1, %v2309_v25  ;;  %v2298_v29 = vld [vmem:[%s2907_s0 + $0x68] sm:$0xff]   ;;  %v2299_v31 = vld [vmem:[%s2907_s0 + $0x70] sm:$0xff]   ;;  %v2300_v33 = vld [vmem:[%s2907_s0 + $0x78] sm:$0xff]   ;;  %vm1816_vm7 = vcmask 1044484   ;;  %vm1818_vm8 = vcmask 1045509   ;;  %vm1820_vm9 = vcmask 1046534  }
  0x2b   :  { %v2313_v34 = vld [vmem:[%s2907_s0 + $0xe0] sm:$0xff]   ;;  %v2314_v35 = vld [vmem:[%s2907_s0 + $0xe8] sm:$0xff]   ;;  %v2315_v36 = vld [vmem:[%s2907_s0 + $0xf0] sm:$0xff]   ;;  %vm1822_vm10 = vcmask 1047559  }
  0x2c   :  { %2132 = vmatpush3.bf16.msra.mxu1 %v2319_v22  ;;  %v2316_v37 = vld [vmem:[%s2907_s0 + $0xf8] sm:$0xff]   ;;  %v2540_v38 = vld [vmem:[%s2909_s2] ss:$0 sm:$0xff]  ;;  %v2322_v47 = vld [vmem:[%s2912_s5 + $0x8] sm:$0xff]  }
  0x2d   :  { %2133 = vmatprep.subr.bf16.mxu1 %v2320_v27  ;;  %v2321_v46 = vld [vmem:[%s2912_s5] sm:$0xff]   ;;  %v2323_v54 = vld [vmem:[%s2912_s5 + $0x10] sm:$0xff]   ;;  %v2324_v63 = vld [vmem:[%s2912_s5 + $0x18] sm:$0xff]  }
  0x2e   :  { %2084 = vmatmul.mubr.msk.bf16.gmra.mrb[20].mxu0 %vm266_vm1, %v2296_v24  ;;  %2199 = vmatprep.subr.bf16.mxu0 %v2321_v46  ;;  %v2325_v7 = vld [vmem:[%s2912_s5 + $0x20] sm:$0xff]   ;;  %v2326_v25 = vld [vmem:[%s2912_s5 + $0x28] sm:$0xff]  }
  0x2f   :  { %2087 = vmatprep.mubr.msk.bf16.mxu0 %vm266_vm1, %v2297_v26  ;;  %2200 = vmatpush3.bf16.msra.mxu0 %v2321_v46 }
  0x30   :  { %2134 = vmatpush3.bf16.msra.mxu1 %v2320_v27  ;;  %2201 = vmatprep.subr.bf16.mxu0 %v2322_v47 }
  0x31   :  { %2112 = vmatmul.mubr.msk.bf16.gmra.mrb[16].mxu1 %vm266_vm1, %v2310_v28 }
  0x32   :  { %2115 = vmatprep.mubr.msk.bf16.mxu1 %vm266_vm1, %v2311_v30 }
  0x33   :  { %2202 = vmatpush3.bf16.msra.mxu0 %v2322_v47 }
  0x34   :  { %2203 = vmatprep.subr.bf16.mxu0 %v2323_v54 }
  0x36   :  { %2088 = vmatmul.mubr.msk.bf16.gmra.mrb[24].mxu0 %vm266_vm1, %v2298_v29 }
  0x37   :  { %2091 = vmatprep.mubr.msk.bf16.mxu0 %vm266_vm1, %v2299_v31  ;;  %2204 = vmatpush3.bf16.msra.mxu0 %v2323_v54 }
  0x38   :  { %2205 = vmatprep.subr.bf16.mxu0 %v2324_v63 }
  0x39   :  { %2116 = vmatmul.mubr.msk.bf16.gmra.mrb[20].mxu1 %vm266_vm1, %v2312_v32 }
  0x3a   :  { %2119 = vmatprep.mubr.msk.bf16.mxu1 %vm266_vm1, %v2313_v34 }
  0x3b   :  { %2206 = vmatpush3.bf16.msra.mxu0 %v2324_v63 }
  0x3c   :  { %2207 = vmatprep.subr.bf16.mxu0 %v2325_v7 }
  0x3e   :  { %2092 = vmatmul.mubr.msk.bf16.gmra.mrb[28].mxu0 %vm266_vm1, %v2300_v33 }
  0x3f   :  { %2208 = vmatpush3.bf16.msra.mxu0 %v2325_v7 }
  0x40   :  { %2209 = vmatprep.subr.bf16.mxu0 %v2326_v25 }
  0x41   :  { %2120 = vmatmul.mubr.msk.bf16.gmra.mrb[24].mxu1 %vm266_vm1, %v2314_v35 }
  0x42   :  { %2123 = vmatprep.mubr.msk.bf16.mxu1 %vm266_vm1, %v2315_v36 }
  0x43   :  { %2210 = vmatpush3.bf16.msra.mxu0 %v2326_v25 }
  0x49   :  { %2124 = vmatmul.mubr.msk.bf16.gmra.mrb[28].mxu1 %vm266_vm1, %v2316_v37  ;;  %v2327_v37 = vld [vmem:[%s2912_s5 + $0x30] sm:$0xff]  }
  0x4a   :  { %2211 = vmatprep.subr.bf16.mxu0 %v2327_v37 }
  0x4b   :  { %2212 = vmatpush3.bf16.msra.mxu0 %v2327_v37 }
  0xd9   :  { %v2065_v39 = vpop.f32.mrb[0].mxu0 }
  0xda   :  { %v410_v40 = vadd.f32 %v2065_v39, %v2540_v38  ;;  %v401_v41 = vpop.f32.mrb[1].mxu0  ;;  %v2097_v6 = vpop.f32.mrb[0].mxu1 }
  0xdb   :  { %v402_v42 = vadd.f32 %v2540_v38, %v401_v41  ;;  %v2066_v43 = vpop.f32.mrb[2].mxu0  ;;  %v538_v10 = vadd.f32 %v2097_v6, %v2540_v38  ;;  %v529_v11 = vpop.f32.mrb[1].mxu1 }
  0xdc   :  { %v413_v44 = vadd.f32 %v2066_v43, %v2540_v38  ;;  %v404_v45 = vpop.f32.mrb[3].mxu0  ;;  %v658_v49 = vmax.f32 %v410_v40, 0.0  ;;  %v530_v14 = vadd.f32 %v2540_v38, %v529_v11  ;;  %v2098_v15 = vpop.f32.mrb[2].mxu1 }
  0xdd   :  { %v405_v48 = vadd.f32 %v2540_v38, %v404_v45  ;;  %v656_v51 = vmax.f32 %v402_v42, 0.0  ;;  %v690_v18 = vmax.f32 %v538_v10, 0.0  ;;  %v541_v19 = vadd.f32 %v2098_v15, %v2540_v38  ;;  %v532_v20 = vpop.f32.mrb[3].mxu1 }
  0xde   :  { %v659_v50 = vmax.f32 %v413_v44, 0.0  ;;  %v688_v23 = vmax.f32 %v530_v14, 0.0  ;;  %v533_v24 = vadd.f32 %v2540_v38, %v532_v20 }
  0xdf   :  { %v657_v52 = vmax.f32 %v405_v48, 0.0  ;;  %v691_v27 = vmax.f32 %v541_v19, 0.0 }
  0xe0   :  { %v721_v53 = vpack.c.bf16 %v659_v50, %v658_v49  ;;  %v689_v30 = vmax.f32 %v533_v24, 0.0 }
  0xe1   :  { %v720_v55 = vpack.c.bf16 %v657_v52, %v656_v51  ;;  %v2069_v56 = vpop.f32.mrb[4].mxu0  ;;  %v2580_v33 = vpack.c.bf16 %v691_v27, %v690_v18 }
  0xe2   :  { %v426_v57 = vadd.f32 %v2069_v56, %v2540_v38  ;;  %v417_v58 = vpop.f32.mrb[5].mxu0  ;;  %v2582_v35 = vpack.c.bf16 %v689_v30, %v688_v23  ;;  %v2101_v36 = vpop.f32.mrb[4].mxu1 }
  0xe3   :  { %v418_v59 = vadd.f32 %v2540_v38, %v417_v58  ;;  %v2070_v60 = vpop.f32.mrb[6].mxu0  ;;  %2135 = vmatprep.mubr.msk.bf16.mxu1 %vm791_vm2, %v720_v55  ;;  %v554_v41 = vadd.f32 %v2101_v36, %v2540_v38  ;;  %v545_v42 = vpop.f32.mrb[5].mxu1 }
  0xe4   :  { %v429_v61 = vadd.f32 %v2070_v60, %v2540_v38  ;;  %v420_v62 = vpop.f32.mrb[7].mxu0  ;;  %2136 = vmatmul.mubr.msk.bf16.vlgmr.msra.gmra.mrb[32].mxu1 %vm791_vm2, %v721_v53  ;;  %v662_v1 = vmax.f32 %v426_v57, 0.0  ;;  %v546_v45 = vadd.f32 %v2540_v38, %v545_v42  ;;  %v2102_v46 = vpop.f32.mrb[6].mxu1 }
  0xe5   :  { %v421_v0 = vadd.f32 %v2540_v38, %v420_v62  ;;  %v660_v3 = vmax.f32 %v418_v59, 0.0  ;;  %v694_v49 = vmax.f32 %v554_v41, 0.0  ;;  %v557_v50 = vadd.f32 %v2102_v46, %v2540_v38  ;;  %v548_v51 = vpop.f32.mrb[7].mxu1 }
  0xe6   :  { %v663_v2 = vmax.f32 %v429_v61, 0.0  ;;  %v692_v54 = vmax.f32 %v546_v45, 0.0  ;;  %v549_v55 = vadd.f32 %v2540_v38, %v548_v51 }
  0xe7   :  { %v661_v4 = vmax.f32 %v421_v0, 0.0  ;;  %v695_v57 = vmax.f32 %v557_v50, 0.0 }
  0xe8   :  { %v723_v5 = vpack.c.bf16 %v663_v2, %v662_v1  ;;  %v693_v60 = vmax.f32 %v549_v55, 0.0 }
  0xe9   :  { %v722_v8 = vpack.c.bf16 %v661_v4, %v660_v3  ;;  %v2073_v9 = vpop.f32.mrb[8].mxu0  ;;  %v2597_v63 = vpack.c.bf16 %v695_v57, %v694_v49 }
  0xea   :  { %v442_v12 = vadd.f32 %v2073_v9, %v2540_v38  ;;  %v433_v13 = vpop.f32.mrb[9].mxu0  ;;  %v2599_v1 = vpack.c.bf16 %v693_v60, %v692_v54  ;;  %v2105_v2 = vpop.f32.mrb[8].mxu1 }
  0xeb   :  { %v434_v16 = vadd.f32 %v2540_v38, %v433_v13  ;;  %v2074_v17 = vpop.f32.mrb[10].mxu0  ;;  %2139 = vmatprep.mubr.msk.bf16.mxu1 %vm791_vm2, %v722_v8  ;;  %v561_v6 = vpop.f32.mrb[9].mxu1 }
  0xec   :  { %v445_v21 = vadd.f32 %v2074_v17, %v2540_v38  ;;  %v436_v22 = vpop.f32.mrb[11].mxu0  ;;  %2140 = vmatmul.mubr.msk.bf16.gmra.mrb[36].mxu1 %vm791_vm2, %v723_v5  ;;  %v666_v28 = vmax.f32 %v442_v12, 0.0  ;;  %v570_v5 = vadd.f32 %v2105_v2, %v2540_v38  ;;  %v562_v9 = vadd.f32 %v2540_v38, %v561_v6  ;;  %v2106_v10 = vpop.f32.mrb[10].mxu1 }
  0xed   :  { %v437_v26 = vadd.f32 %v2540_v38, %v436_v22  ;;  %v664_v31 = vmax.f32 %v434_v16, 0.0  ;;  %v573_v14 = vadd.f32 %v2106_v10, %v2540_v38  ;;  %v564_v15 = vpop.f32.mrb[11].mxu1 }
  0xee   :  { %v667_v29 = vmax.f32 %v445_v21, 0.0  ;;  %v698_v13 = vmax.f32 %v570_v5, 0.0  ;;  %v696_v18 = vmax.f32 %v562_v9, 0.0  ;;  %v565_v19 = vadd.f32 %v2540_v38, %v564_v15 }
  0xef   :  { %v665_v32 = vmax.f32 %v437_v26, 0.0  ;;  %v699_v21 = vmax.f32 %v573_v14, 0.0 }
  0xf0   :  { %v725_v34 = vpack.c.bf16 %v667_v29, %v666_v28  ;;  %v697_v24 = vmax.f32 %v565_v19, 0.0 }
  0xf1   :  { %v724_v39 = vpack.c.bf16 %v665_v32, %v664_v31  ;;  %v2077_v40 = vpop.f32.mrb[12].mxu0  ;;  %v2611_v27 = vpack.c.bf16 %v699_v21, %v698_v13 }
  0xf2   :  { %v458_v43 = vadd.f32 %v2077_v40, %v2540_v38  ;;  %v449_v44 = vpop.f32.mrb[13].mxu0  ;;  %v2613_v29 = vpack.c.bf16 %v697_v24, %v696_v18 }
  0xf3   :  { %v450_v47 = vadd.f32 %v2540_v38, %v449_v44  ;;  %v2078_v48 = vpop.f32.mrb[14].mxu0  ;;  %2143 = vmatprep.mubr.msk.bf16.mxu1 %vm791_vm2, %v724_v39 }
  0xf4   :  { %v461_v52 = vadd.f32 %v2078_v48, %v2540_v38  ;;  %v452_v53 = vpop.f32.mrb[15].mxu0  ;;  %2144 = vmatmul.mubr.msk.bf16.gmra.mrb[40].mxu1 %vm791_vm2, %v725_v34  ;;  %v670_v58 = vmax.f32 %v458_v43, 0.0 }
  0xf5   :  { %v453_v56 = vadd.f32 %v2540_v38, %v452_v53  ;;  %v668_v61 = vmax.f32 %v450_v47, 0.0 }
  0xf6   :  { %v671_v59 = vmax.f32 %v461_v52, 0.0 }
  0xf7   :  { %v669_v62 = vmax.f32 %v453_v56, 0.0 }
  0xf8   :  { %v727_v0 = vpack.c.bf16 %v671_v59, %v670_v58 }
  0xf9   :  { %v726_v3 = vpack.c.bf16 %v669_v62, %v668_v61  ;;  %v2081_v4 = vpop.f32.mrb[16].mxu0 }
  0xfa   :  { %v474_v7 = vadd.f32 %v2081_v4, %v2540_v38  ;;  %v465_v8 = vpop.f32.mrb[17].mxu0 }
  0xfb   :  { %v466_v11 = vadd.f32 %v2540_v38, %v465_v8  ;;  %v2082_v12 = vpop.f32.mrb[18].mxu0  ;;  %2147 = vmatprep.mubr.msk.bf16.mxu1 %vm791_vm2, %v726_v3 }
  0xfc   :  { %v477_v16 = vadd.f32 %v2082_v12, %v2540_v38  ;;  %v468_v17 = vpop.f32.mrb[19].mxu0  ;;  %2148 = vmatmul.mubr.msk.bf16.gmra.mrb[44].mxu1 %vm791_vm2, %v727_v0  ;;  %v674_v22 = vmax.f32 %v474_v7, 0.0  ;;  %v2109_v30 = vpop.f32.mrb[12].mxu1 }
  0xfd   :  { %v469_v20 = vadd.f32 %v2540_v38, %v468_v17  ;;  %v672_v25 = vmax.f32 %v466_v11, 0.0  ;;  %v586_v34 = vadd.f32 %v2109_v30, %v2540_v38  ;;  %v577_v36 = vpop.f32.mrb[13].mxu1 }
  0xfe   :  { %v675_v23 = vmax.f32 %v477_v16, 0.0  ;;  %v578_v40 = vadd.f32 %v2540_v38, %v577_v36  ;;  %v2110_v41 = vpop.f32.mrb[14].mxu1 }
  0xff   :  { %v673_v26 = vmax.f32 %v469_v20, 0.0  ;;  %v702_v44 = vmax.f32 %v586_v34, 0.0  ;;  %v589_v45 = vadd.f32 %v2110_v41, %v2540_v38  ;;  %v580_v46 = vpop.f32.mrb[15].mxu1 }
 0x100   :  { %v729_v28 = vpack.c.bf16 %v675_v23, %v674_v22  ;;  %v700_v49 = vmax.f32 %v578_v40, 0.0  ;;  %v581_v50 = vadd.f32 %v2540_v38, %v580_v46 }
 0x101   :  { %v728_v31 = vpack.c.bf16 %v673_v26, %v672_v25  ;;  %v2085_v32 = vpop.f32.mrb[20].mxu0  ;;  %v703_v52 = vmax.f32 %v589_v45, 0.0 }
 0x102   :  { %v490_v37 = vadd.f32 %v2085_v32, %v2540_v38  ;;  %v481_v39 = vpop.f32.mrb[21].mxu0  ;;  %v701_v55 = vmax.f32 %v581_v50, 0.0 }
 0x103   :  { %v482_v42 = vadd.f32 %v2540_v38, %v481_v39  ;;  %v2086_v43 = vpop.f32.mrb[22].mxu0  ;;  %2151 = vmatprep.mubr.msk.bf16.mxu1 %vm791_vm2, %v728_v31  ;;  %v2625_v58 = vpack.c.bf16 %v703_v52, %v702_v44 }
 0x104   :  { %v493_v47 = vadd.f32 %v2086_v43, %v2540_v38  ;;  %v484_v48 = vpop.f32.mrb[23].mxu0  ;;  %2152 = vmatmul.mubr.msk.bf16.gmra.mrb[48].mxu1 %vm791_vm2, %v729_v28  ;;  %v678_v53 = vmax.f32 %v490_v37, 0.0  ;;  %v2627_v60 = vpack.c.bf16 %v701_v55, %v700_v49  ;;  %v2113_v61 = vpop.f32.mrb[16].mxu1 }
 0x105   :  { %v485_v51 = vadd.f32 %v2540_v38, %v484_v48  ;;  %v676_v56 = vmax.f32 %v482_v42, 0.0  ;;  %v602_v2 = vadd.f32 %v2113_v61, %v2540_v38  ;;  %v593_v3 = vpop.f32.mrb[17].mxu1 }
 0x106   :  { %v679_v54 = vmax.f32 %v493_v47, 0.0  ;;  %v594_v6 = vadd.f32 %v2540_v38, %v593_v3  ;;  %v2114_v7 = vpop.f32.mrb[18].mxu1 }
 0x107   :  { %v677_v57 = vmax.f32 %v485_v51, 0.0  ;;  %v706_v10 = vmax.f32 %v602_v2, 0.0  ;;  %v605_v11 = vadd.f32 %v2114_v7, %v2540_v38  ;;  %v596_v12 = vpop.f32.mrb[19].mxu1 }
 0x108   :  { %v731_v59 = vpack.c.bf16 %v679_v54, %v678_v53  ;;  %v704_v15 = vmax.f32 %v594_v6, 0.0  ;;  %v597_v16 = vadd.f32 %v2540_v38, %v596_v12 }
 0x109   :  { %v730_v62 = vpack.c.bf16 %v677_v57, %v676_v56  ;;  %v2089_v0 = vpop.f32.mrb[24].mxu0  ;;  %v707_v18 = vmax.f32 %v605_v11, 0.0 }
 0x10a   :  { %v506_v4 = vadd.f32 %v2089_v0, %v2540_v38  ;;  %v497_v5 = vpop.f32.mrb[25].mxu0  ;;  %v705_v21 = vmax.f32 %v597_v16, 0.0 }
 0x10b   :  { %v498_v8 = vadd.f32 %v2540_v38, %v497_v5  ;;  %v2090_v9 = vpop.f32.mrb[26].mxu0  ;;  %2155 = vmatprep.mubr.msk.bf16.mxu1 %vm791_vm2, %v730_v62  ;;  %v2639_v24 = vpack.c.bf16 %v707_v18, %v706_v10 }
 0x10c   :  { %v509_v13 = vadd.f32 %v2090_v9, %v2540_v38  ;;  %v500_v14 = vpop.f32.mrb[27].mxu0  ;;  %2156 = vmatmul.mubr.msk.bf16.gmra.mrb[52].mxu1 %vm791_vm2, %v731_v59  ;;  %v682_v19 = vmax.f32 %v506_v4, 0.0  ;;  %v2641_v26 = vpack.c.bf16 %v705_v21, %v704_v15  ;;  %v2117_v28 = vpop.f32.mrb[20].mxu1 }
 0x10d   :  { %v501_v17 = vadd.f32 %v2540_v38, %v500_v14  ;;  %v680_v22 = vmax.f32 %v498_v8, 0.0  ;;  %v618_v32 = vadd.f32 %v2117_v28, %v2540_v38  ;;  %v609_v34 = vpop.f32.mrb[21].mxu1 }
 0x10e   :  { %v683_v20 = vmax.f32 %v509_v13, 0.0  ;;  %v610_v39 = vadd.f32 %v2540_v38, %v609_v34  ;;  %v2118_v40 = vpop.f32.mrb[22].mxu1 }
 0x10f   :  { %v681_v23 = vmax.f32 %v501_v17, 0.0  ;;  %v710_v43 = vmax.f32 %v618_v32, 0.0  ;;  %v621_v44 = vadd.f32 %v2118_v40, %v2540_v38  ;;  %v612_v45 = vpop.f32.mrb[23].mxu1 }
 0x110   :  { %v733_v25 = vpack.c.bf16 %v683_v20, %v682_v19  ;;  %v708_v48 = vmax.f32 %v610_v39, 0.0  ;;  %v613_v49 = vadd.f32 %v2540_v38, %v612_v45 }
 0x111   :  { %v732_v30 = vpack.c.bf16 %v681_v23, %v680_v22  ;;  %v2093_v31 = vpop.f32.mrb[28].mxu0  ;;  %v711_v51 = vmax.f32 %v621_v44, 0.0 }
 0x112   :  { %v522_v36 = vadd.f32 %v2093_v31, %v2540_v38  ;;  %v513_v37 = vpop.f32.mrb[29].mxu0  ;;  %v709_v54 = vmax.f32 %v613_v49, 0.0 }
 0x113   :  { %v514_v41 = vadd.f32 %v2540_v38, %v513_v37  ;;  %v2094_v42 = vpop.f32.mrb[30].mxu0  ;;  %2159 = vmatprep.mubr.msk.bf16.mxu1 %vm791_vm2, %v732_v30  ;;  %v747_v57 = vpack.c.bf16 %v711_v51, %v710_v43 }
 0x114   :  { %v525_v46 = vadd.f32 %v2094_v42, %v2540_v38  ;;  %v516_v47 = vpop.f32.mrb[31].mxu0  ;;  %2160 = vmatmul.mubr.msk.bf16.gmra.mrb[56].mxu1 %vm791_vm2, %v733_v25  ;;  %v686_v52 = vmax.f32 %v522_v36, 0.0  ;;  %v746_v61 = vpack.c.bf16 %v709_v54, %v708_v48  ;;  %v2121_v62 = vpop.f32.mrb[24].mxu1 }
 0x115   :  { %v517_v50 = vadd.f32 %v2540_v38, %v516_v47  ;;  %v684_v55 = vmax.f32 %v514_v41, 0.0  ;;  %v634_v2 = vadd.f32 %v2121_v62, %v2540_v38  ;;  %v625_v3 = vpop.f32.mrb[25].mxu1 }
 0x116   :  { %v687_v53 = vmax.f32 %v525_v46, 0.0  ;;  %v626_v4 = vadd.f32 %v2540_v38, %v625_v3  ;;  %v2122_v5 = vpop.f32.mrb[26].mxu1 }
 0x117   :  { %v685_v56 = vmax.f32 %v517_v50, 0.0  ;;  %v714_v6 = vmax.f32 %v634_v2, 0.0  ;;  %v637_v7 = vadd.f32 %v2122_v5, %v2540_v38  ;;  %v628_v8 = vpop.f32.mrb[27].mxu1 }
 0x118   :  { %v735_v59 = vpack.c.bf16 %v687_v53, %v686_v52  ;;  %v712_v9 = vmax.f32 %v626_v4, 0.0  ;;  %v629_v10 = vadd.f32 %v2540_v38, %v628_v8 }
 0x119   :  { %v734_v0 = vpack.c.bf16 %v685_v56, %v684_v55  ;;  %v715_v11 = vmax.f32 %v637_v7, 0.0 }
 0x11a   :  { %v713_v12 = vmax.f32 %v629_v10, 0.0 }
 0x11b   :  { %2163 = vmatprep.mubr.msk.bf16.mxu1 %vm791_vm2, %v734_v0  ;;  %v749_v13 = vpack.c.bf16 %v715_v11, %v714_v6 }
 0x11c   :  { %2164 = vmatmul.mubr.msk.bf16.gmra.mrb[60].mxu1 %vm791_vm2, %v735_v59  ;;  %v748_v14 = vpack.c.bf16 %v713_v12, %v712_v9  ;;  %v2125_v15 = vpop.f32.mrb[28].mxu1 }
 0x11d   :  { %2167 = vmatprep.mubr.msk.bf16.mxu1 %vm791_vm2, %v2582_v35  ;;  %v650_v16 = vadd.f32 %v2125_v15, %v2540_v38  ;;  %v641_v17 = vpop.f32.mrb[29].mxu1 }
 0x11e   :  { %v642_v18 = vadd.f32 %v2540_v38, %v641_v17  ;;  %v2126_v19 = vpop.f32.mrb[30].mxu1 }
 0x11f   :  { %v718_v20 = vmax.f32 %v650_v16, 0.0  ;;  %v653_v21 = vadd.f32 %v2126_v19, %v2540_v38  ;;  %v644_v22 = vpop.f32.mrb[31].mxu1 }
 0x120   :  { %v716_v23 = vmax.f32 %v642_v18, 0.0  ;;  %v645_v35 = vadd.f32 %v2540_v38, %v644_v22  ;;  %v2328_v38 = vld [vmem:[%s2912_s5 + $0x38] sm:$0xff]  }
 0x121   :  { %v719_v25 = vmax.f32 %v653_v21, 0.0  ;;  %2213 = vmatprep.subr.bf16.mxu0 %v2328_v38 }
 0x122   :  { %v717_v28 = vmax.f32 %v645_v35, 0.0  ;;  %2214 = vmatpush3.bf16.msra.mxu0 %v2328_v38 }
 0x123   :  { %v751_v30 = vpack.c.bf16 %v719_v25, %v718_v20 }
 0x124   :  { %2168 = vmatmul.mubr.msk.bf16.gmra.mrb[64].mxu1 %vm791_vm2, %v2580_v33  ;;  %v750_v31 = vpack.c.bf16 %v717_v28, %v716_v23  ;;  %v2695_v33 = vld [vmem:[%s2911_s4] ss:$0 sm:$0xff] }
 0x125   :  { %2171 = vmatprep.mubr.msk.bf16.mxu1 %vm791_vm2, %v2599_v1 }
 0x12c   :  { %2172 = vmatmul.mubr.msk.bf16.gmra.mrb[68].mxu1 %vm791_vm2, %v2597_v63 }
 0x12d   :  { %2175 = vmatprep.mubr.msk.bf16.mxu1 %vm791_vm2, %v2613_v29 }
 0x134   :  { %2176 = vmatmul.mubr.msk.bf16.gmra.mrb[72].mxu1 %vm791_vm2, %v2611_v27 }
 0x135   :  { %2179 = vmatprep.mubr.msk.bf16.mxu1 %vm791_vm2, %v2627_v60 }
 0x13c   :  { %2180 = vmatmul.mubr.msk.bf16.gmra.mrb[76].mxu1 %vm791_vm2, %v2625_v58 }
 0x13d   :  { %2183 = vmatprep.mubr.msk.bf16.mxu1 %vm791_vm2, %v2641_v26 }
 0x144   :  { %2184 = vmatmul.mubr.msk.bf16.gmra.mrb[80].mxu1 %vm791_vm2, %v2639_v24 }
 0x145   :  { %2187 = vmatprep.mubr.msk.bf16.mxu1 %vm791_vm2, %v746_v61 }
 0x14c   :  { %2188 = vmatmul.mubr.msk.bf16.gmra.mrb[84].mxu1 %vm791_vm2, %v747_v57 }
 0x14d   :  { %2191 = vmatprep.mubr.msk.bf16.mxu1 %vm791_vm2, %v748_v14 }
 0x154   :  { %2192 = vmatmul.mubr.msk.bf16.gmra.mrb[88].mxu1 %vm791_vm2, %v749_v13 }
 0x155   :  { %2195 = vmatprep.mubr.msk.bf16.mxu1 %vm791_vm2, %v750_v31 }
 0x15c   :  { %2196 = vmatmul.mubr.msk.bf16.gmra.mrb[92].mxu1 %vm791_vm2, %v751_v30 }
 0x1b7   :  { %v2137_v63 = vpop.f32.mrb[32].mxu1 }
 0x1b8   :  { %v931_v1 = vadd.f32 %v2137_v63, %v2695_v33  ;;  %v922_v27 = vpop.f32.mrb[33].mxu1 }
 0x1b9   :  { %v923_v29 = vadd.f32 %v2695_v33, %v922_v27  ;;  %v2138_v58 = vpop.f32.mrb[34].mxu1 }
 0x1ba   :  { %v934_v60 = vadd.f32 %v2138_v58, %v2695_v33  ;;  %v925_v24 = vpop.f32.mrb[35].mxu1  ;;  %v1179_v32 = vmax.f32 %v931_v1, 0.0 }
 0x1bb   :  { %v926_v26 = vadd.f32 %v2695_v33, %v925_v24  ;;  %v1177_v36 = vmax.f32 %v923_v29, 0.0 }
 0x1bc   :  { %v1180_v34 = vmax.f32 %v934_v60, 0.0 }
 0x1bd   :  { %v1178_v37 = vmax.f32 %v926_v26, 0.0 }
 0x1be   :  { %v1242_v39 = vpack.c.bf16 %v1180_v34, %v1179_v32 }
 0x1bf   :  { %v1241_v40 = vpack.c.bf16 %v1178_v37, %v1177_v36  ;;  %v2141_v41 = vpop.f32.mrb[36].mxu1 }
 0x1c0   :  { %v947_v42 = vadd.f32 %v2141_v41, %v2695_v33  ;;  %v938_v43 = vpop.f32.mrb[37].mxu1 }
 0x1c1   :  { %v939_v44 = vadd.f32 %v2695_v33, %v938_v43  ;;  %v2142_v45 = vpop.f32.mrb[38].mxu1  ;;  %2215 = vmatprep.mubr.bf16.mxu0 %v1241_v40 }
 0x1c2   :  { %v950_v46 = vadd.f32 %v2142_v45, %v2695_v33  ;;  %v941_v47 = vpop.f32.mrb[39].mxu1  ;;  %2216 = vmatmul.mubr.bf16.vlgmr.msra.gmra.mrb[32].mxu0 %v1242_v39  ;;  %v1183_v49 = vmax.f32 %v947_v42, 0.0 }
 0x1c3   :  { %v942_v48 = vadd.f32 %v2695_v33, %v941_v47  ;;  %v1181_v51 = vmax.f32 %v939_v44, 0.0 }
 0x1c4   :  { %v1184_v50 = vmax.f32 %v950_v46, 0.0 }
 0x1c5   :  { %v1182_v52 = vmax.f32 %v942_v48, 0.0 }
 0x1c6   :  { %v1244_v53 = vpack.c.bf16 %v1184_v50, %v1183_v49 }
 0x1c7   :  { %v1243_v54 = vpack.c.bf16 %v1182_v52, %v1181_v51  ;;  %v2145_v55 = vpop.f32.mrb[40].mxu1 }
 0x1c8   :  { %v963_v56 = vadd.f32 %v2145_v55, %v2695_v33  ;;  %v954_v57 = vpop.f32.mrb[41].mxu1 }
 0x1c9   :  { %v955_v59 = vadd.f32 %v2695_v33, %v954_v57  ;;  %v2146_v61 = vpop.f32.mrb[42].mxu1  ;;  %2219 = vmatprep.mubr.bf16.mxu0 %v1243_v54 }
 0x1ca   :  { %v966_v62 = vadd.f32 %v2146_v61, %v2695_v33  ;;  %v957_v0 = vpop.f32.mrb[43].mxu1  ;;  %2220 = vmatmul.mubr.bf16.gmra.mrb[36].mxu0 %v1244_v53  ;;  %v1187_v3 = vmax.f32 %v963_v56, 0.0 }
 0x1cb   :  { %v958_v2 = vadd.f32 %v2695_v33, %v957_v0  ;;  %v1185_v5 = vmax.f32 %v955_v59, 0.0 }
 0x1cc   :  { %v1188_v4 = vmax.f32 %v966_v62, 0.0 }
 0x1cd   :  { %v1186_v6 = vmax.f32 %v958_v2, 0.0 }
 0x1ce   :  { %v1246_v7 = vpack.c.bf16 %v1188_v4, %v1187_v3 }
 0x1cf   :  { %v1245_v8 = vpack.c.bf16 %v1186_v6, %v1185_v5  ;;  %v2149_v9 = vpop.f32.mrb[44].mxu1 }
 0x1d0   :  { %v979_v10 = vadd.f32 %v2149_v9, %v2695_v33  ;;  %v970_v11 = vpop.f32.mrb[45].mxu1 }
 0x1d1   :  { %v971_v12 = vadd.f32 %v2695_v33, %v970_v11  ;;  %v2150_v13 = vpop.f32.mrb[46].mxu1  ;;  %2223 = vmatprep.mubr.bf16.mxu0 %v1245_v8 }
 0x1d2   :  { %v982_v14 = vadd.f32 %v2150_v13, %v2695_v33  ;;  %v973_v15 = vpop.f32.mrb[47].mxu1  ;;  %2224 = vmatmul.mubr.bf16.gmra.mrb[40].mxu0 %v1246_v7  ;;  %v1191_v17 = vmax.f32 %v979_v10, 0.0 }
 0x1d3   :  { %v974_v16 = vadd.f32 %v2695_v33, %v973_v15  ;;  %v1189_v19 = vmax.f32 %v971_v12, 0.0 }
 0x1d4   :  { %v1192_v18 = vmax.f32 %v982_v14, 0.0 }
 0x1d5   :  { %v1190_v20 = vmax.f32 %v974_v16, 0.0 }
 0x1d6   :  { %v1248_v21 = vpack.c.bf16 %v1192_v18, %v1191_v17 }
 0x1d7   :  { %v1247_v22 = vpack.c.bf16 %v1190_v20, %v1189_v19  ;;  %v2153_v23 = vpop.f32.mrb[48].mxu1 }
 0x1d8   :  { %v995_v35 = vadd.f32 %v2153_v23, %v2695_v33  ;;  %v986_v25 = vpop.f32.mrb[49].mxu1 }
 0x1d9   :  { %v987_v28 = vadd.f32 %v2695_v33, %v986_v25  ;;  %v2154_v30 = vpop.f32.mrb[50].mxu1  ;;  %2227 = vmatprep.mubr.bf16.mxu0 %v1247_v22 }
 0x1da   :  { %v998_v31 = vadd.f32 %v2154_v30, %v2695_v33  ;;  %v989_v38 = vpop.f32.mrb[51].mxu1  ;;  %2228 = vmatmul.mubr.bf16.gmra.mrb[44].mxu0 %v1248_v21  ;;  %v1195_v1 = vmax.f32 %v995_v35, 0.0 }
 0x1db   :  { %v990_v63 = vadd.f32 %v2695_v33, %v989_v38  ;;  %v1193_v29 = vmax.f32 %v987_v28, 0.0 }
 0x1dc   :  { %v1196_v27 = vmax.f32 %v998_v31, 0.0 }
 0x1dd   :  { %v1194_v58 = vmax.f32 %v990_v63, 0.0 }
 0x1de   :  { %v1250_v60 = vpack.c.bf16 %v1196_v27, %v1195_v1 }
 0x1df   :  { %v1249_v24 = vpack.c.bf16 %v1194_v58, %v1193_v29  ;;  %v2157_v26 = vpop.f32.mrb[52].mxu1 }
 0x1e0   :  { %v1011_v32 = vadd.f32 %v2157_v26, %v2695_v33  ;;  %v1002_v34 = vpop.f32.mrb[53].mxu1 }
 0x1e1   :  { %v1003_v36 = vadd.f32 %v2695_v33, %v1002_v34  ;;  %v2158_v37 = vpop.f32.mrb[54].mxu1  ;;  %2231 = vmatprep.mubr.bf16.mxu0 %v1249_v24 }
 0x1e2   :  { %v1014_v39 = vadd.f32 %v2158_v37, %v2695_v33  ;;  %v1005_v40 = vpop.f32.mrb[55].mxu1  ;;  %2232 = vmatmul.mubr.bf16.gmra.mrb[48].mxu0 %v1250_v60  ;;  %v1199_v42 = vmax.f32 %v1011_v32, 0.0 }
 0x1e3   :  { %v1006_v41 = vadd.f32 %v2695_v33, %v1005_v40  ;;  %v1197_v44 = vmax.f32 %v1003_v36, 0.0 }
 0x1e4   :  { %v1200_v43 = vmax.f32 %v1014_v39, 0.0 }
 0x1e5   :  { %v1198_v45 = vmax.f32 %v1006_v41, 0.0 }
 0x1e6   :  { %v1252_v46 = vpack.c.bf16 %v1200_v43, %v1199_v42 }
 0x1e7   :  { %v1251_v47 = vpack.c.bf16 %v1198_v45, %v1197_v44  ;;  %v2161_v48 = vpop.f32.mrb[56].mxu1 }
 0x1e8   :  { %v1027_v49 = vadd.f32 %v2161_v48, %v2695_v33  ;;  %v1018_v50 = vpop.f32.mrb[57].mxu1 }
 0x1e9   :  { %v1019_v51 = vadd.f32 %v2695_v33, %v1018_v50  ;;  %v2162_v52 = vpop.f32.mrb[58].mxu1  ;;  %2235 = vmatprep.mubr.bf16.mxu0 %v1251_v47 }
 0x1ea   :  { %v1030_v53 = vadd.f32 %v2162_v52, %v2695_v33  ;;  %v1021_v54 = vpop.f32.mrb[59].mxu1  ;;  %2236 = vmatmul.mubr.bf16.gmra.mrb[52].mxu0 %v1252_v46  ;;  %v1203_v56 = vmax.f32 %v1027_v49, 0.0 }
 0x1eb   :  { %v1022_v55 = vadd.f32 %v2695_v33, %v1021_v54  ;;  %v1201_v59 = vmax.f32 %v1019_v51, 0.0 }
 0x1ec   :  { %v1204_v57 = vmax.f32 %v1030_v53, 0.0 }
 0x1ed   :  { %v1202_v61 = vmax.f32 %v1022_v55, 0.0 }
 0x1ee   :  { %v1254_v62 = vpack.c.bf16 %v1204_v57, %v1203_v56 }
 0x1ef   :  { %v1253_v0 = vpack.c.bf16 %v1202_v61, %v1201_v59  ;;  %v2165_v2 = vpop.f32.mrb[60].mxu1 }
 0x1f0   :  { %v1043_v3 = vadd.f32 %v2165_v2, %v2695_v33  ;;  %v1034_v4 = vpop.f32.mrb[61].mxu1 }
 0x1f1   :  { %v1035_v5 = vadd.f32 %v2695_v33, %v1034_v4  ;;  %v2166_v6 = vpop.f32.mrb[62].mxu1  ;;  %2239 = vmatprep.mubr.bf16.mxu0 %v1253_v0 }
 0x1f2   :  { %v1046_v7 = vadd.f32 %v2166_v6, %v2695_v33  ;;  %v1037_v8 = vpop.f32.mrb[63].mxu1  ;;  %2240 = vmatmul.mubr.bf16.gmra.mrb[56].mxu0 %v1254_v62  ;;  %v1207_v10 = vmax.f32 %v1043_v3, 0.0 }
 0x1f3   :  { %v1038_v9 = vadd.f32 %v2695_v33, %v1037_v8  ;;  %v1205_v12 = vmax.f32 %v1035_v5, 0.0 }
 0x1f4   :  { %v1208_v11 = vmax.f32 %v1046_v7, 0.0 }
 0x1f5   :  { %v1206_v13 = vmax.f32 %v1038_v9, 0.0 }
 0x1f6   :  { %v1256_v14 = vpack.c.bf16 %v1208_v11, %v1207_v10 }
 0x1f7   :  { %v1255_v15 = vpack.c.bf16 %v1206_v13, %v1205_v12  ;;  %v2169_v16 = vpop.f32.mrb[64].mxu1 }
 0x1f8   :  { %v1059_v17 = vadd.f32 %v2169_v16, %v2695_v33  ;;  %v1050_v18 = vpop.f32.mrb[65].mxu1 }
 0x1f9   :  { %v1051_v19 = vadd.f32 %v2695_v33, %v1050_v18  ;;  %v2170_v20 = vpop.f32.mrb[66].mxu1  ;;  %2243 = vmatprep.mubr.bf16.mxu0 %v1255_v15 }
 0x1fa   :  { %v1062_v21 = vadd.f32 %v2170_v20, %v2695_v33  ;;  %v1053_v22 = vpop.f32.mrb[67].mxu1  ;;  %2244 = vmatmul.mubr.bf16.gmra.mrb[60].mxu0 %v1256_v14  ;;  %v1211_v35 = vmax.f32 %v1059_v17, 0.0 }
 0x1fb   :  { %v1054_v23 = vadd.f32 %v2695_v33, %v1053_v22  ;;  %v1209_v28 = vmax.f32 %v1051_v19, 0.0 }
 0x1fc   :  { %v1212_v25 = vmax.f32 %v1062_v21, 0.0 }
 0x1fd   :  { %v1210_v30 = vmax.f32 %v1054_v23, 0.0 }
 0x1fe   :  { %v1258_v31 = vpack.c.bf16 %v1212_v25, %v1211_v35 }
 0x1ff   :  { %v1257_v38 = vpack.c.bf16 %v1210_v30, %v1209_v28  ;;  %v2173_v63 = vpop.f32.mrb[68].mxu1 }
 0x200   :  { %v1075_v1 = vadd.f32 %v2173_v63, %v2695_v33  ;;  %v1066_v27 = vpop.f32.mrb[69].mxu1 }
 0x201   :  { %v1067_v29 = vadd.f32 %v2695_v33, %v1066_v27  ;;  %v2174_v58 = vpop.f32.mrb[70].mxu1  ;;  %2247 = vmatprep.mubr.bf16.mxu0 %v1257_v38 }
 0x202   :  { %v1078_v60 = vadd.f32 %v2174_v58, %v2695_v33  ;;  %v1069_v24 = vpop.f32.mrb[71].mxu1  ;;  %2248 = vmatmul.mubr.bf16.gmra.mrb[64].mxu0 %v1258_v31  ;;  %v1215_v32 = vmax.f32 %v1075_v1, 0.0 }
 0x203   :  { %v1070_v26 = vadd.f32 %v2695_v33, %v1069_v24  ;;  %v1213_v36 = vmax.f32 %v1067_v29, 0.0 }
 0x204   :  { %v1216_v34 = vmax.f32 %v1078_v60, 0.0 }
 0x205   :  { %v1214_v37 = vmax.f32 %v1070_v26, 0.0 }
 0x206   :  { %v1260_v39 = vpack.c.bf16 %v1216_v34, %v1215_v32 }
 0x207   :  { %v1259_v40 = vpack.c.bf16 %v1214_v37, %v1213_v36  ;;  %v2177_v41 = vpop.f32.mrb[72].mxu1 }
 0x208   :  { %v1091_v42 = vadd.f32 %v2177_v41, %v2695_v33  ;;  %v1082_v43 = vpop.f32.mrb[73].mxu1 }
 0x209   :  { %v1083_v44 = vadd.f32 %v2695_v33, %v1082_v43  ;;  %v2178_v45 = vpop.f32.mrb[74].mxu1  ;;  %2251 = vmatprep.mubr.bf16.mxu0 %v1259_v40 }
 0x20a   :  { %v1094_v46 = vadd.f32 %v2178_v45, %v2695_v33  ;;  %v1085_v47 = vpop.f32.mrb[75].mxu1  ;;  %2252 = vmatmul.mubr.bf16.gmra.mrb[68].mxu0 %v1260_v39  ;;  %v1219_v49 = vmax.f32 %v1091_v42, 0.0 }
 0x20b   :  { %v1086_v48 = vadd.f32 %v2695_v33, %v1085_v47  ;;  %v1217_v51 = vmax.f32 %v1083_v44, 0.0 }
 0x20c   :  { %v1220_v50 = vmax.f32 %v1094_v46, 0.0 }
 0x20d   :  { %v1218_v52 = vmax.f32 %v1086_v48, 0.0 }
 0x20e   :  { %v1262_v53 = vpack.c.bf16 %v1220_v50, %v1219_v49 }
 0x20f   :  { %v1261_v54 = vpack.c.bf16 %v1218_v52, %v1217_v51  ;;  %v2181_v55 = vpop.f32.mrb[76].mxu1 }
 0x210   :  { %v1107_v56 = vadd.f32 %v2181_v55, %v2695_v33  ;;  %v1098_v57 = vpop.f32.mrb[77].mxu1 }
 0x211   :  { %v1099_v59 = vadd.f32 %v2695_v33, %v1098_v57  ;;  %v2182_v61 = vpop.f32.mrb[78].mxu1  ;;  %2255 = vmatprep.mubr.bf16.mxu0 %v1261_v54 }
 0x212   :  { %v1110_v62 = vadd.f32 %v2182_v61, %v2695_v33  ;;  %v1101_v0 = vpop.f32.mrb[79].mxu1  ;;  %2256 = vmatmul.mubr.bf16.gmra.mrb[72].mxu0 %v1262_v53  ;;  %v1223_v3 = vmax.f32 %v1107_v56, 0.0 }
 0x213   :  { %v1102_v2 = vadd.f32 %v2695_v33, %v1101_v0  ;;  %v1221_v5 = vmax.f32 %v1099_v59, 0.0 }
 0x214   :  { %v1224_v4 = vmax.f32 %v1110_v62, 0.0 }
 0x215   :  { %v1222_v6 = vmax.f32 %v1102_v2, 0.0  ;;  %v2764_v2 = vld [vmem:[%s2913_s6] ss:$0 sm:$0xff]  ;;  %s2353_s6 = smov [#allocation2]  }
 0x216   :  { %v1264_v7 = vpack.c.bf16 %v1224_v4, %v1223_v3  ;;  %s1832_s18 = sshll.u32 %s2353_s6, 4  ;;  %s1833_s18 = int_to_ptr.vmem [resolvable:$true] %s1832_s18 }
 0x217   :  { %v1263_v8 = vpack.c.bf16 %v1222_v6, %v1221_v5  ;;  %v2185_v9 = vpop.f32.mrb[80].mxu1  ;;  %s2329_s19 = scalar_lea.vmem %s1833_s18, 128  ;;  %p2334_p1 = scmp.lt.s32.totalorder %s1833_s18, %s1833_s18 }
 0x218   :  { %v1123_v10 = vadd.f32 %v2185_v9, %v2695_v33  ;;  %v1114_v11 = vpop.f32.mrb[81].mxu1  ;;  %p2330_p0 = scmp.ne.s32.totalorder %s1833_s18, %s2329_s19  ;;  %p2335_p2 = scmp.lt.s32.totalorder %s2329_s19, %s2329_s19 }
 0x219   :  { %v1115_v12 = vadd.f32 %v2695_v33, %v1114_v11  ;;  %v2186_v13 = vpop.f32.mrb[82].mxu1  ;;  %2259 = vmatprep.mubr.bf16.mxu0 %v1263_v8 }
 0x21a   :  { %v1126_v14 = vadd.f32 %v2186_v13, %v2695_v33  ;;  %v1117_v15 = vpop.f32.mrb[83].mxu1  ;;  %2260 = vmatmul.mubr.bf16.gmra.mrb[76].mxu0 %v1264_v7  ;;  %v1227_v17 = vmax.f32 %v1123_v10, 0.0  ;;  %p2336_p3 = por %p2335_p2, %p2334_p1 }
 0x21b   :  { %v1118_v16 = vadd.f32 %v2695_v33, %v1117_v15  ;;  %v1225_v19 = vmax.f32 %v1115_v12, 0.0 }
 0x21c   :  { %v1228_v18 = vmax.f32 %v1126_v14, 0.0  ;;  %p2337_p4 = pnand %p2336_p3, %p2330_p0 }
 0x21d   :  { %v1226_v20 = vmax.f32 %v1118_v16, 0.0 }
 0x21e   :  { %v1266_v21 = vpack.c.bf16 %v1228_v18, %v1227_v17 }
 0x21f   :  { %v1265_v22 = vpack.c.bf16 %v1226_v20, %v1225_v19  ;;  %v2189_v23 = vpop.f32.mrb[84].mxu1 }
 0x220   :  { %v1139_v35 = vadd.f32 %v2189_v23, %v2695_v33  ;;  %v1130_v25 = vpop.f32.mrb[85].mxu1 }
 0x221   :  { %v1131_v28 = vadd.f32 %v2695_v33, %v1130_v25  ;;  %v2190_v30 = vpop.f32.mrb[86].mxu1  ;;  %2263 = vmatprep.mubr.bf16.mxu0 %v1265_v22 }
 0x222   :  { %v1142_v31 = vadd.f32 %v2190_v30, %v2695_v33  ;;  %v1133_v38 = vpop.f32.mrb[87].mxu1  ;;  %2264 = vmatmul.mubr.bf16.gmra.mrb[80].mxu0 %v1266_v21  ;;  %v1231_v1 = vmax.f32 %v1139_v35, 0.0 }
 0x223   :  { %v1134_v63 = vadd.f32 %v2695_v33, %v1133_v38  ;;  %v1229_v29 = vmax.f32 %v1131_v28, 0.0 }
 0x224   :  { %v1232_v27 = vmax.f32 %v1142_v31, 0.0 }
 0x225   :  { %v1230_v58 = vmax.f32 %v1134_v63, 0.0 }
 0x226   :  { %v1268_v60 = vpack.c.bf16 %v1232_v27, %v1231_v1 }
 0x227   :  { %v1267_v24 = vpack.c.bf16 %v1230_v58, %v1229_v29  ;;  %v2193_v26 = vpop.f32.mrb[88].mxu1 }
 0x228   :  { %v1155_v32 = vadd.f32 %v2193_v26, %v2695_v33  ;;  %v1146_v34 = vpop.f32.mrb[89].mxu1 }
 0x229   :  { %v1147_v36 = vadd.f32 %v2695_v33, %v1146_v34  ;;  %v2194_v37 = vpop.f32.mrb[90].mxu1  ;;  %2267 = vmatprep.mubr.bf16.mxu0 %v1267_v24 }
 0x22a   :  { %v1158_v39 = vadd.f32 %v2194_v37, %v2695_v33  ;;  %v1149_v40 = vpop.f32.mrb[91].mxu1  ;;  %2268 = vmatmul.mubr.bf16.gmra.mrb[84].mxu0 %v1268_v60  ;;  %v1235_v42 = vmax.f32 %v1155_v32, 0.0 }
 0x22b   :  { %v1150_v41 = vadd.f32 %v2695_v33, %v1149_v40  ;;  %v1233_v44 = vmax.f32 %v1147_v36, 0.0 }
 0x22c   :  { %v1236_v43 = vmax.f32 %v1158_v39, 0.0 }
 0x22d   :  { %v1234_v45 = vmax.f32 %v1150_v41, 0.0 }
 0x22e   :  { %v1270_v46 = vpack.c.bf16 %v1236_v43, %v1235_v42 }
 0x22f   :  { %v1269_v47 = vpack.c.bf16 %v1234_v45, %v1233_v44  ;;  %v2197_v48 = vpop.f32.mrb[92].mxu1 }
 0x230   :  { %v1171_v49 = vadd.f32 %v2197_v48, %v2695_v33  ;;  %v1162_v50 = vpop.f32.mrb[93].mxu1 }
 0x231   :  { %v1163_v51 = vadd.f32 %v2695_v33, %v1162_v50  ;;  %v2198_v52 = vpop.f32.mrb[94].mxu1  ;;  %2271 = vmatprep.mubr.bf16.mxu0 %v1269_v47 }
 0x232   :  { %v1174_v53 = vadd.f32 %v2198_v52, %v2695_v33  ;;  %v1165_v54 = vpop.f32.mrb[95].mxu1  ;;  %2272 = vmatmul.mubr.bf16.gmra.mrb[88].mxu0 %v1270_v46  ;;  %v1239_v56 = vmax.f32 %v1171_v49, 0.0 }
 0x233   :  { %v1166_v55 = vadd.f32 %v2695_v33, %v1165_v54  ;;  %v1237_v59 = vmax.f32 %v1163_v51, 0.0 }
 0x234   :  { %v1240_v57 = vmax.f32 %v1174_v53, 0.0 }
 0x235   :  { %v1238_v61 = vmax.f32 %v1166_v55, 0.0 }
 0x236   :  { %v1272_v62 = vpack.c.bf16 %v1240_v57, %v1239_v56 }
 0x237   :  { %v1271_v0 = vpack.c.bf16 %v1238_v61, %v1237_v59 }
 0x239   :  { %2275 = vmatprep.mubr.bf16.mxu0 %v1271_v0 }
 0x23a   :  { %2276 = vmatmul.mubr.bf16.gmra.mrb[92].mxu0 %v1272_v62 }
 0x295   :  { %v2217_v3 = vpop.f32.mrb[32].mxu0 }
 0x296   :  { %v1378_v4 = vpop.f32.mrb[33].mxu0  ;;  %v1387_v7 = vadd.f32 %v2217_v3, %v2764_v2 }
 0x297   :  { %v1379_v5 = vadd.f32 %v2764_v2, %v1378_v4  ;;  %v2218_v6 = vpop.f32.mrb[34].mxu0 }
 0x298   :  { %v1381_v33 = vpop.f32.mrb[35].mxu0  ;;  %v1390_v10 = vadd.f32 %v2218_v6, %v2764_v2  ;;  %v1637_v13 = vsel %vm1633_vm3, %v1387_v7, -inf }
 0x299   :  { %v1382_v8 = vadd.f32 %v2764_v2, %v1381_v33  ;;  %v1634_v9 = vsel %vm1633_vm3, %v1379_v5, -inf }
 0x29a   :  { %v1639_v17 = vsel %vm1633_vm3, %v1390_v10, -inf }
 0x29b   :  { %v1635_v11 = vsel %vm1633_vm3, %v1382_v8, -inf }
 0x29c   :  { %v1636_v12 = vmax.f32 %v1634_v9, %v1635_v11 }
 0x29d   :  { %v2221_v14 = vpop.f32.mrb[36].mxu0 }
 0x29e   :  { %v1638_v15 = vmax.f32 %v1636_v12, %v1637_v13  ;;  %v1394_v16 = vpop.f32.mrb[37].mxu0  ;;  %v1403_v22 = vadd.f32 %v2221_v14, %v2764_v2 }
 0x29f   :  { %v1395_v18 = vadd.f32 %v2764_v2, %v1394_v16  ;;  %v2222_v19 = vpop.f32.mrb[38].mxu0 }
 0x2a0   :  { %v1640_v20 = vmax.f32 %v1638_v15, %v1639_v17  ;;  %v1397_v21 = vpop.f32.mrb[39].mxu0  ;;  %v1406_v28 = vadd.f32 %v2222_v19, %v2764_v2  ;;  %v1645_v38 = vsel %vm1633_vm3, %v1403_v22, -inf }
 0x2a1   :  { %v1641_v23 = vsel %vm1633_vm3, %v1395_v18, -inf  ;;  %v1398_v35 = vadd.f32 %v2764_v2, %v1397_v21 }
 0x2a2   :  { %v1642_v25 = vmax.f32 %v1640_v20, %v1641_v23  ;;  %v1647_v29 = vsel %vm1633_vm3, %v1406_v28, -inf }
 0x2a3   :  { %v1643_v30 = vsel %vm1633_vm3, %v1398_v35, -inf }
 0x2a4   :  { %v1644_v31 = vmax.f32 %v1642_v25, %v1643_v30 }
 0x2a5   :  { %v2225_v63 = vpop.f32.mrb[40].mxu0 }
 0x2a6   :  { %v1646_v1 = vmax.f32 %v1644_v31, %v1645_v38  ;;  %v1410_v27 = vpop.f32.mrb[41].mxu0  ;;  %v1419_v32 = vadd.f32 %v2225_v63, %v2764_v2 }
 0x2a7   :  { %v1411_v58 = vadd.f32 %v2764_v2, %v1410_v27  ;;  %v2226_v60 = vpop.f32.mrb[42].mxu0 }
 0x2a8   :  { %v1648_v24 = vmax.f32 %v1646_v1, %v1647_v29  ;;  %v1413_v26 = vpop.f32.mrb[43].mxu0  ;;  %v1422_v37 = vadd.f32 %v2226_v60, %v2764_v2  ;;  %v1658_v41 = vsel %vm1633_vm3, %v1419_v32, -inf }
 0x2a9   :  { %v1414_v34 = vadd.f32 %v2764_v2, %v1413_v26  ;;  %v1655_v36 = vsel %vm1633_vm3, %v1411_v58, -inf }
 0x2aa   :  { %v1660_v45 = vsel %vm1633_vm3, %v1422_v37, -inf  ;;  %v1649_v48 = vrot.slane %v1648_v24, 4 }
 0x2ab   :  { %v1656_v39 = vsel %vm1633_vm3, %v1414_v34, -inf }
 0x2ac   :  { %v1657_v40 = vmax.f32 %v1655_v36, %v1656_v39  ;;  %v1650_v57 = vmax.f32 %v1648_v24, %v1649_v48 }
 0x2ad   :  { %v2229_v42 = vpop.f32.mrb[44].mxu0 }
 0x2ae   :  { %v1659_v43 = vmax.f32 %v1657_v40, %v1658_v41  ;;  %v1426_v44 = vpop.f32.mrb[45].mxu0  ;;  %v1435_v51 = vadd.f32 %v2229_v42, %v2764_v2  ;;  %v1651_v33 = vrot.slane %v1650_v57, 2 }
 0x2af   :  { %v1427_v46 = vadd.f32 %v2764_v2, %v1426_v44  ;;  %v2230_v47 = vpop.f32.mrb[46].mxu0 }
 0x2b0   :  { %v1661_v49 = vmax.f32 %v1659_v43, %v1660_v45  ;;  %v1429_v50 = vpop.f32.mrb[47].mxu0  ;;  %v1438_v55 = vadd.f32 %v2230_v47, %v2764_v2  ;;  %v1666_v61 = vsel %vm1633_vm3, %v1435_v51, -inf  ;;  %v1652_v15 = vmax.f32 %v1650_v57, %v1651_v33 }
 0x2b1   :  { %v1662_v52 = vsel %vm1633_vm3, %v1427_v46, -inf  ;;  %v1430_v53 = vadd.f32 %v2764_v2, %v1429_v50 }
 0x2b2   :  { %v1663_v54 = vmax.f32 %v1661_v49, %v1662_v52  ;;  %v1668_v4 = vsel %vm1633_vm3, %v1438_v55, -inf  ;;  %v1653_v28 = vrot.slane %v1652_v15, 1 }
 0x2b3   :  { %v1664_v56 = vsel %vm1633_vm3, %v1430_v53, -inf }
 0x2b4   :  { %v1665_v59 = vmax.f32 %v1663_v54, %v1664_v56  ;;  %v1654_v26 = vmax.f32 %v1652_v15, %v1653_v28 }
 0x2b5   :  { %v2233_v62 = vpop.f32.mrb[48].mxu0 }
 0x2b6   :  { %v1667_v0 = vmax.f32 %v1665_v59, %v1666_v61  ;;  %v1442_v3 = vpop.f32.mrb[49].mxu0  ;;  %v1451_v9 = vadd.f32 %v2233_v62, %v2764_v2 }
 0x2b7   :  { %v1443_v5 = vadd.f32 %v2764_v2, %v1442_v3  ;;  %v2234_v6 = vpop.f32.mrb[50].mxu0 }
 0x2b8   :  { %v1669_v7 = vmax.f32 %v1667_v0, %v1668_v4  ;;  %v1445_v8 = vpop.f32.mrb[51].mxu0  ;;  %v1454_v13 = vadd.f32 %v2234_v6, %v2764_v2  ;;  %v1679_v18 = vsel %vm1633_vm3, %v1451_v9, -inf }
 0x2b9   :  { %v1446_v10 = vadd.f32 %v2764_v2, %v1445_v8  ;;  %v1676_v12 = vsel %vm1633_vm3, %v1443_v5, -inf }
 0x2ba   :  { %v1670_v11 = vrot.slane %v1669_v7, 4  ;;  %v1681_v23 = vsel %vm1633_vm3, %v1454_v13, -inf }
 0x2bb   :  { %v1677_v14 = vsel %vm1633_vm3, %v1446_v10, -inf }
 0x2bc   :  { %v1671_v16 = vmax.f32 %v1669_v7, %v1670_v11  ;;  %v1678_v17 = vmax.f32 %v1676_v12, %v1677_v14 }
 0x2bd   :  { %v2237_v19 = vpop.f32.mrb[52].mxu0 }
 0x2be   :  { %v1672_v20 = vrot.slane %v1671_v16, 2  ;;  %v1680_v21 = vmax.f32 %v1678_v17, %v1679_v18  ;;  %v1458_v22 = vpop.f32.mrb[53].mxu0  ;;  %v1467_v63 = vadd.f32 %v2237_v19, %v2764_v2 }
 0x2bf   :  { %v1459_v35 = vadd.f32 %v2764_v2, %v1458_v22  ;;  %v2238_v25 = vpop.f32.mrb[54].mxu0 }
 0x2c0   :  { %v1673_v30 = vmax.f32 %v1671_v16, %v1672_v20  ;;  %v1682_v31 = vmax.f32 %v1680_v21, %v1681_v23  ;;  %v1461_v38 = vpop.f32.mrb[55].mxu0  ;;  %v1470_v60 = vadd.f32 %v2238_v25, %v2764_v2  ;;  %v1687_v36 = vsel %vm1633_vm3, %v1467_v63, -inf }
 0x2c1   :  { %v1683_v1 = vsel %vm1633_vm3, %v1459_v35, -inf  ;;  %v1462_v27 = vadd.f32 %v2764_v2, %v1461_v38 }
 0x2c2   :  { %v1674_v29 = vrot.slane %v1673_v30, 1  ;;  %v1684_v58 = vmax.f32 %v1682_v31, %v1683_v1  ;;  %v1689_v42 = vsel %vm1633_vm3, %v1470_v60, -inf }
 0x2c3   :  { %v1685_v24 = vsel %vm1633_vm3, %v1462_v27, -inf }
 0x2c4   :  { %v1675_v32 = vmax.f32 %v1673_v30, %v1674_v29  ;;  %v1686_v34 = vmax.f32 %v1684_v58, %v1685_v24 }
 0x2c5   :  { %v2241_v37 = vpop.f32.mrb[56].mxu0 }
 0x2c6   :  { %v1688_v39 = vmax.f32 %v1686_v34, %v1687_v36  ;;  %v1474_v40 = vpop.f32.mrb[57].mxu0  ;;  %v1811_v41 = vsel %vm1810_vm4, %v1675_v32, %v1654_v26  ;;  %v1483_v47 = vadd.f32 %v2241_v37, %v2764_v2 }
 0x2c7   :  { %v1475_v43 = vadd.f32 %v2764_v2, %v1474_v40  ;;  %v2242_v44 = vpop.f32.mrb[58].mxu0 }
 0x2c8   :  { %v1690_v45 = vmax.f32 %v1688_v39, %v1689_v42  ;;  %v1477_v46 = vpop.f32.mrb[59].mxu0  ;;  %v1486_v51 = vadd.f32 %v2242_v44, %v2764_v2  ;;  %v1700_v55 = vsel %vm1633_vm3, %v1483_v47, -inf }
 0x2c9   :  { %v1478_v48 = vadd.f32 %v2764_v2, %v1477_v46  ;;  %v1697_v50 = vsel %vm1633_vm3, %v1475_v43, -inf }
 0x2ca   :  { %v1691_v49 = vrot.slane %v1690_v45, 4  ;;  %v1702_v62 = vsel %vm1633_vm3, %v1486_v51, -inf }
 0x2cb   :  { %v1698_v52 = vsel %vm1633_vm3, %v1478_v48, -inf }
 0x2cc   :  { %v1692_v53 = vmax.f32 %v1690_v45, %v1691_v49  ;;  %v1699_v54 = vmax.f32 %v1697_v50, %v1698_v52 }
 0x2cd   :  { %v2245_v56 = vpop.f32.mrb[60].mxu0 }
 0x2ce   :  { %v1693_v57 = vrot.slane %v1692_v53, 2  ;;  %v1701_v59 = vmax.f32 %v1699_v54, %v1700_v55  ;;  %v1490_v61 = vpop.f32.mrb[61].mxu0  ;;  %v1499_v33 = vadd.f32 %v2245_v56, %v2764_v2 }
 0x2cf   :  { %v1491_v0 = vadd.f32 %v2764_v2, %v1490_v61  ;;  %v2246_v3 = vpop.f32.mrb[62].mxu0 }
 0x2d0   :  { %v1694_v4 = vmax.f32 %v1692_v53, %v1693_v57  ;;  %v1703_v5 = vmax.f32 %v1701_v59, %v1702_v62  ;;  %v1493_v6 = vpop.f32.mrb[63].mxu0  ;;  %v1502_v11 = vadd.f32 %v2246_v3, %v2764_v2  ;;  %v1708_v15 = vsel %vm1633_vm3, %v1499_v33, -inf }
 0x2d1   :  { %v1704_v7 = vsel %vm1633_vm3, %v1491_v0, -inf  ;;  %v1494_v8 = vadd.f32 %v2764_v2, %v1493_v6 }
 0x2d2   :  { %v1695_v9 = vrot.slane %v1694_v4, 1  ;;  %v1705_v10 = vmax.f32 %v1703_v5, %v1704_v7  ;;  %v1710_v20 = vsel %vm1633_vm3, %v1502_v11, -inf }
 0x2d3   :  { %v1706_v12 = vsel %vm1633_vm3, %v1494_v8, -inf }
 0x2d4   :  { %v1696_v13 = vmax.f32 %v1694_v4, %v1695_v9  ;;  %v1707_v14 = vmax.f32 %v1705_v10, %v1706_v12 }
 0x2d5   :  { %v2249_v16 = vpop.f32.mrb[64].mxu0 }
 0x2d6   :  { %v1709_v17 = vmax.f32 %v1707_v14, %v1708_v15  ;;  %v1506_v18 = vpop.f32.mrb[65].mxu0  ;;  %v1813_v19 = vsel %vm1812_vm5, %v1696_v13, %v1811_v41  ;;  %v1515_v25 = vadd.f32 %v2249_v16, %v2764_v2 }
 0x2d7   :  { %v1507_v21 = vadd.f32 %v2764_v2, %v1506_v18  ;;  %v2250_v22 = vpop.f32.mrb[66].mxu0 }
 0x2d8   :  { %v1711_v23 = vmax.f32 %v1709_v17, %v1710_v20  ;;  %v1509_v35 = vpop.f32.mrb[67].mxu0  ;;  %v1518_v38 = vadd.f32 %v2250_v22, %v2764_v2  ;;  %v1721_v29 = vsel %vm1633_vm3, %v1515_v25, -inf }
 0x2d9   :  { %v1510_v28 = vadd.f32 %v2764_v2, %v1509_v35  ;;  %v1718_v31 = vsel %vm1633_vm3, %v1507_v21, -inf }
 0x2da   :  { %v1712_v30 = vrot.slane %v1711_v23, 4  ;;  %v1723_v32 = vsel %vm1633_vm3, %v1518_v38, -inf }
 0x2db   :  { %v1719_v63 = vsel %vm1633_vm3, %v1510_v28, -inf }
 0x2dc   :  { %v1713_v1 = vmax.f32 %v1711_v23, %v1712_v30  ;;  %v1720_v27 = vmax.f32 %v1718_v31, %v1719_v63 }
 0x2dd   :  { %v2253_v58 = vpop.f32.mrb[68].mxu0 }
 0x2de   :  { %v1714_v60 = vrot.slane %v1713_v1, 2  ;;  %v1722_v24 = vmax.f32 %v1720_v27, %v1721_v29  ;;  %v1522_v26 = vpop.f32.mrb[69].mxu0  ;;  %v1531_v41 = vadd.f32 %v2253_v58, %v2764_v2 }
 0x2df   :  { %v1523_v34 = vadd.f32 %v2764_v2, %v1522_v26  ;;  %v2254_v36 = vpop.f32.mrb[70].mxu0 }
 0x2e0   :  { %v1715_v37 = vmax.f32 %v1713_v1, %v1714_v60  ;;  %v1724_v39 = vmax.f32 %v1722_v24, %v1723_v32  ;;  %v1525_v40 = vpop.f32.mrb[71].mxu0  ;;  %v1534_v46 = vadd.f32 %v2254_v36, %v2764_v2  ;;  %v1729_v50 = vsel %vm1633_vm3, %v1531_v41, -inf }
 0x2e1   :  { %v1725_v42 = vsel %vm1633_vm3, %v1523_v34, -inf  ;;  %v1526_v43 = vadd.f32 %v2764_v2, %v1525_v40 }
 0x2e2   :  { %v1716_v44 = vrot.slane %v1715_v37, 1  ;;  %v1726_v45 = vmax.f32 %v1724_v39, %v1725_v42  ;;  %v1731_v55 = vsel %vm1633_vm3, %v1534_v46, -inf }
 0x2e3   :  { %v1727_v47 = vsel %vm1633_vm3, %v1526_v43, -inf }
 0x2e4   :  { %v1717_v48 = vmax.f32 %v1715_v37, %v1716_v44  ;;  %v1728_v49 = vmax.f32 %v1726_v45, %v1727_v47 }
 0x2e5   :  { %v2257_v51 = vpop.f32.mrb[72].mxu0 }
 0x2e6   :  { %v1730_v52 = vmax.f32 %v1728_v49, %v1729_v50  ;;  %v1538_v53 = vpop.f32.mrb[73].mxu0  ;;  %v1815_v54 = vsel %vm1814_vm6, %v1717_v48, %v1813_v19  ;;  %v1547_v62 = vadd.f32 %v2257_v51, %v2764_v2 }
 0x2e7   :  { %v1539_v56 = vadd.f32 %v2764_v2, %v1538_v53  ;;  %v2258_v57 = vpop.f32.mrb[74].mxu0 }
 0x2e8   :  { %v1732_v59 = vmax.f32 %v1730_v52, %v1731_v55  ;;  %v1541_v61 = vpop.f32.mrb[75].mxu0  ;;  %v1550_v5 = vadd.f32 %v2258_v57, %v2764_v2  ;;  %v1742_v8 = vsel %vm1633_vm3, %v1547_v62, -inf }
 0x2e9   :  { %v1542_v0 = vadd.f32 %v2764_v2, %v1541_v61  ;;  %v1739_v4 = vsel %vm1633_vm3, %v1539_v56, -inf }
 0x2ea   :  { %v1733_v3 = vrot.slane %v1732_v59, 4  ;;  %v1744_v13 = vsel %vm1633_vm3, %v1550_v5, -inf }
 0x2eb   :  { %v1740_v6 = vsel %vm1633_vm3, %v1542_v0, -inf }
 0x2ec   :  { %v1734_v33 = vmax.f32 %v1732_v59, %v1733_v3  ;;  %v1741_v7 = vmax.f32 %v1739_v4, %v1740_v6 }
 0x2ed   :  { %v2261_v9 = vpop.f32.mrb[76].mxu0 }
 0x2ee   :  { %v1735_v10 = vrot.slane %v1734_v33, 2  ;;  %v1743_v11 = vmax.f32 %v1741_v7, %v1742_v8  ;;  %v1554_v12 = vpop.f32.mrb[77].mxu0  ;;  %v1563_v19 = vadd.f32 %v2261_v9, %v2764_v2 }
 0x2ef   :  { %v1555_v14 = vadd.f32 %v2764_v2, %v1554_v12  ;;  %v2262_v15 = vpop.f32.mrb[78].mxu0 }
 0x2f0   :  { %v1736_v16 = vmax.f32 %v1734_v33, %v1735_v10  ;;  %v1745_v17 = vmax.f32 %v1743_v11, %v1744_v13  ;;  %v1557_v18 = vpop.f32.mrb[79].mxu0  ;;  %v1566_v35 = vadd.f32 %v2262_v15, %v2764_v2  ;;  %v1750_v31 = vsel %vm1633_vm3, %v1563_v19, -inf }
 0x2f1   :  { %v1746_v20 = vsel %vm1633_vm3, %v1555_v14, -inf  ;;  %v1558_v21 = vadd.f32 %v2764_v2, %v1557_v18 }
 0x2f2   :  { %v1737_v22 = vrot.slane %v1736_v16, 1  ;;  %v1747_v23 = vmax.f32 %v1745_v17, %v1746_v20  ;;  %v1752_v29 = vsel %vm1633_vm3, %v1566_v35, -inf }
 0x2f3   :  { %v1748_v25 = vsel %vm1633_vm3, %v1558_v21, -inf }
 0x2f4   :  { %v1738_v28 = vmax.f32 %v1736_v16, %v1737_v22  ;;  %v1749_v30 = vmax.f32 %v1747_v23, %v1748_v25 }
 0x2f5   :  { %v2265_v38 = vpop.f32.mrb[80].mxu0 }
 0x2f6   :  { %v1751_v63 = vmax.f32 %v1749_v30, %v1750_v31  ;;  %v1570_v1 = vpop.f32.mrb[81].mxu0  ;;  %v1817_v27 = vsel %vm1816_vm7, %v1738_v28, %v1815_v54  ;;  %v1579_v32 = vadd.f32 %v2265_v38, %v2764_v2 }
 0x2f7   :  { %v1571_v58 = vadd.f32 %v2764_v2, %v1570_v1  ;;  %v2266_v60 = vpop.f32.mrb[82].mxu0 }
 0x2f8   :  { %v1753_v24 = vmax.f32 %v1751_v63, %v1752_v29  ;;  %v1573_v26 = vpop.f32.mrb[83].mxu0  ;;  %v1582_v39 = vadd.f32 %v2266_v60, %v2764_v2  ;;  %v1763_v43 = vsel %vm1633_vm3, %v1579_v32, -inf }
 0x2f9   :  { %v1574_v34 = vadd.f32 %v2764_v2, %v1573_v26  ;;  %v1760_v37 = vsel %vm1633_vm3, %v1571_v58, -inf }
 0x2fa   :  { %v1754_v36 = vrot.slane %v1753_v24, 4  ;;  %v1765_v48 = vsel %vm1633_vm3, %v1582_v39, -inf }
 0x2fb   :  { %v1761_v40 = vsel %vm1633_vm3, %v1574_v34, -inf }
 0x2fc   :  { %v1755_v41 = vmax.f32 %v1753_v24, %v1754_v36  ;;  %v1762_v42 = vmax.f32 %v1760_v37, %v1761_v40 }
 0x2fd   :  { %v2269_v44 = vpop.f32.mrb[84].mxu0 }
 0x2fe   :  { %v1756_v45 = vrot.slane %v1755_v41, 2  ;;  %v1764_v46 = vmax.f32 %v1762_v42, %v1763_v43  ;;  %v1586_v47 = vpop.f32.mrb[85].mxu0  ;;  %v1595_v54 = vadd.f32 %v2269_v44, %v2764_v2 }
 0x2ff   :  { %v1587_v49 = vadd.f32 %v2764_v2, %v1586_v47  ;;  %v2270_v50 = vpop.f32.mrb[86].mxu0 }
 0x300   :  { %v1757_v51 = vmax.f32 %v1755_v41, %v1756_v45  ;;  %v1766_v52 = vmax.f32 %v1764_v46, %v1765_v48  ;;  %v1589_v53 = vpop.f32.mrb[87].mxu0  ;;  %v1598_v61 = vadd.f32 %v2270_v50, %v2764_v2  ;;  %v1771_v4 = vsel %vm1633_vm3, %v1595_v54, -inf }
 0x301   :  { %v1767_v55 = vsel %vm1633_vm3, %v1587_v49, -inf  ;;  %v1590_v56 = vadd.f32 %v2764_v2, %v1589_v53 }
 0x302   :  { %v1758_v57 = vrot.slane %v1757_v51, 1  ;;  %v1768_v59 = vmax.f32 %v1766_v52, %v1767_v55  ;;  %v1773_v8 = vsel %vm1633_vm3, %v1598_v61, -inf }
 0x303   :  { %v1769_v62 = vsel %vm1633_vm3, %v1590_v56, -inf }
 0x304   :  { %v1770_v0 = vmax.f32 %v1768_v59, %v1769_v62  ;;  %v1759_v3 = vmax.f32 %v1757_v51, %v1758_v57 }
 0x305   :  { %v2273_v5 = vpop.f32.mrb[88].mxu0 }
 0x306   :  { %v1772_v6 = vmax.f32 %v1770_v0, %v1771_v4  ;;  %v1602_v33 = vpop.f32.mrb[89].mxu0  ;;  %v1819_v7 = vsel %vm1818_vm8, %v1759_v3, %v1817_v27  ;;  %v1611_v13 = vadd.f32 %v2273_v5, %v2764_v2 }
 0x307   :  { %v1603_v9 = vadd.f32 %v2764_v2, %v1602_v33  ;;  %v2274_v10 = vpop.f32.mrb[90].mxu0 }
 0x308   :  { %v1774_v11 = vmax.f32 %v1772_v6, %v1773_v8  ;;  %v1605_v12 = vpop.f32.mrb[91].mxu0  ;;  %v1614_v17 = vadd.f32 %v2274_v10, %v2764_v2  ;;  %v1784_v21 = vsel %vm1633_vm3, %v1611_v13, -inf }
 0x309   :  { %v1606_v14 = vadd.f32 %v2764_v2, %v1605_v12  ;;  %v1781_v16 = vsel %vm1633_vm3, %v1603_v9, -inf }
 0x30a   :  { %v1775_v15 = vrot.slane %v1774_v11, 4  ;;  %v1786_v28 = vsel %vm1633_vm3, %v1614_v17, -inf }
 0x30b   :  { %v1782_v18 = vsel %vm1633_vm3, %v1606_v14, -inf }
 0x30c   :  { %v1776_v19 = vmax.f32 %v1774_v11, %v1775_v15  ;;  %v1783_v20 = vmax.f32 %v1781_v16, %v1782_v18 }
 0x30d   :  { %v2277_v22 = vpop.f32.mrb[92].mxu0 }
 0x30e   :  { %v1777_v23 = vrot.slane %v1776_v19, 2  ;;  %v1785_v35 = vmax.f32 %v1783_v20, %v1784_v21  ;;  %v1618_v25 = vpop.f32.mrb[93].mxu0  ;;  %v1627_v27 = vadd.f32 %v2277_v22, %v2764_v2 }
 0x30f   :  { %v1619_v30 = vadd.f32 %v2764_v2, %v1618_v25  ;;  %v2278_v31 = vpop.f32.mrb[94].mxu0 }
 0x310   :  { %v1787_v38 = vmax.f32 %v1785_v35, %v1786_v28  ;;  %v1621_v63 = vpop.f32.mrb[95].mxu0  ;;  %v1778_v1 = vmax.f32 %v1776_v19, %v1777_v23  ;;  %v1630_v26 = vadd.f32 %v2278_v31, %v2764_v2  ;;  %v1792_v37 = vsel %vm1633_vm3, %v1627_v27, -inf }
 0x311   :  { %v1788_v29 = vsel %vm1633_vm3, %v1619_v30, -inf  ;;  %v1622_v58 = vadd.f32 %v2764_v2, %v1621_v63 }
 0x312   :  { %v1789_v60 = vmax.f32 %v1787_v38, %v1788_v29  ;;  %v1779_v24 = vrot.slane %v1778_v1, 1  ;;  %v1794_v41 = vsel %vm1633_vm3, %v1630_v26, -inf }
 0x313   :  { %v1790_v32 = vsel %vm1633_vm3, %v1622_v58, -inf }
 0x314   :  { %v1791_v34 = vmax.f32 %v1789_v60, %v1790_v32  ;;  %v1780_v36 = vmax.f32 %v1778_v1, %v1779_v24 }
 0x316   :  { %v1793_v39 = vmax.f32 %v1791_v34, %v1792_v37  ;;  %v1821_v40 = vsel %vm1820_vm9, %v1780_v36, %v1819_v7 }
 0x318   :  { %v1795_v42 = vmax.f32 %v1793_v39, %v1794_v41 }
 0x31a   :  { %v1796_v43 = vrot.slane %v1795_v42, 4 }
 0x31c   :  { %v1797_v44 = vmax.f32 %v1795_v42, %v1796_v43 }
 0x31e   :  { %v1798_v45 = vrot.slane %v1797_v44, 2 }
 0x320   :  { %v1799_v46 = vmax.f32 %v1797_v44, %v1798_v45 }
 0x322   :  { %v1800_v47 = vrot.slane %v1799_v46, 1 }
 0x324   :  { %v1801_v2 = vmax.f32 %v1799_v46, %v1800_v47 }
 0x326   :  { %v1823_v48 = vsel %vm1822_vm10, %v1801_v2, %v1821_v40 }
 0x327   :  { %1825 = vst.msk [vmem:[#allocation2] sm:$0xff] %vm1633_vm3, %v1823_v48 }
 0x328   :  { %2340 = shalt.err (!%p2337_p4)
}
 0x329   :  { %s2341_s22 = scalar_lea.hbm %s2914_s7, 128 }
 0x32a   :  { %p2342_p5 = scmp.ne.s32.totalorder %s2914_s7, %s2341_s22  ;;  %p2345_p6 = scmp.lt.u32.totalorder %s2341_s22, %s2914_s7 }
 0x32c   :  { %p2347_p7 = pnand %p2345_p6, %p2342_p5 }
 0x32e   :  { %2350 = shalt.err (!%p2347_p7)
}
 0x32f   :  { %1835 = dma.vmem_to_hbm [thread:$0]  %s1833_s18, 128, %s2914_s7, [#allocation3]  }
 0x330   :  { %2351 = dma.done.wait [#allocation3], 128  }
 0x331   :  { %2352 = vsyncadd [#allocation3], 4294967168 }
 0x332   :  { %1839 = vsyncpa [#allocation3], 1 }

</bundles_post_ra>
